<compile_context>
chip_gen: v7x
topology: tpu7x:2x2x1
jax: 0.10.0
libtpu: 0.0.40
codegen_flags: <defaults>
</compile_context>

<pallas_src>
import functools

import jax
import jax.numpy as jnp
from jax.experimental import pallas as pl
from jax.experimental.pallas import tpu as pltpu


def _round_up(x, m):
    return ((x + m - 1) // m) * m


_CJ = 128  # j-chunk (sublane) size of the inner compare loop


def _rank_gather_kernel(s_i_ref, s_j_ref, payload_ref, out_ref,
                        rank_ref, sjt_ref, *, Ti, Tj, Kpad):
    """One (ib, jb) step of the tiled rank + gather computation.

    s_i_ref:     [1, Ti]   f32  scores of the elements being ranked (i block)
    s_j_ref:     [1, Tj]   f32  scores of the comparand elements (j block)
    payload_ref: [8, Ti]   f32  fused payload (x1,y1,x2,y2, score, idx, 0, 0)
    out_ref:     [8, Kpad] f32  gathered slab for this i block (lane-dense)
    rank_ref:    [1, Ti]   i32  rank accumulator (VMEM scratch)
    sjt_ref:     [Tj, 128] f32  sublane-major, lane-broadcast copy of s_j
    """
    ib = pl.program_id(0)
    jb = pl.program_id(1)
    n_jb = pl.num_programs(1)

    @pl.when(jb == 0)
    def _():
        rank_ref[...] = jnp.zeros_like(rank_ref)

    # ---- Build sublane-major, lane-broadcast copy of the j scores ----------
    # sjt[r, :] = s_j[jb*Tj + r] on every lane.  Input stays lane-dense; the
    # relayout is a sublane-broadcast + (128,128) transpose per lane group
    # (XLU / store slots, parallel to the VALU compare loop).
    for g in range(Tj // 128):
        row = s_j_ref[:, g * 128:(g + 1) * 128]                  # [1, 128]
        sjt_ref[g * 128:(g + 1) * 128, :] = jnp.broadcast_to(
            row, (128, 128)).T

    i_base = ib * Ti
    j_base = jb * Tj
    n_chunks = Tj // _CJ

    def accumulate(mode):
        # mode 0: every j index < every i index  -> ties count      (>=)
        # mode 1: every j index > every i index  -> strict           (>)
        # mode 2: overlapping blocks             -> full index tie-break
        if mode == 2:
            d0 = (jax.lax.broadcasted_iota(jnp.int32, (_CJ, 128), 0)
                  - jax.lax.broadcasted_iota(jnp.int32, (_CJ, 128), 1))
        for g in range(Ti // 128):
            # Hoisted per i-group: sublane-broadcast of the i scores.
            si = jnp.broadcast_to(
                s_i_ref[:, g * 128:(g + 1) * 128], (_CJ, 128))
            if mode == 2:
                off0 = j_base - (i_base + g * 128)

            def body(c, acc):
                start = pl.multiple_of(c * _CJ, _CJ)
                sj = sjt_ref[pl.ds(start, _CJ), :]               # [_CJ, 128]
                if mode == 0:
                    beats = sj >= si
                elif mode == 1:
                    beats = sj > si
                else:
                    j_lt_i = (d0 + (off0 + c * _CJ)) < 0
                    beats = (sj > si) | ((sj == si) & j_lt_i)
                return acc + beats.astype(jnp.int32)

            acc = jax.lax.fori_loop(0, n_chunks, body,
                                    jnp.zeros((_CJ, 128), jnp.int32),
                                    unroll=2)
            # Deferred sublane reduction: once per i-group per grid step.
            rank_ref[:, g * 128:(g + 1) * 128] += jnp.sum(
                acc, axis=0, keepdims=True)

    all_before = (j_base + Tj) <= i_base
    all_after = j_base >= (i_base + Ti)
    overlap = jnp.logical_not(jnp.logical_or(all_before, all_after))

    @pl.when(all_before)
    def _():
        accumulate(0)

    @pl.when(all_after)
    def _():
        accumulate(1)

    @pl.when(overlap)
    def _():
        accumulate(2)

    # ---- Finalize: gather via one lane-dense MXU matmul per i-block --------
    @pl.when(jb == n_jb - 1)
    def _():
        rank = rank_ref[...]                                      # [1, Ti]
        kio = jax.lax.broadcasted_iota(jnp.int32, (Kpad, Ti), 0)
        onehot = (kio == rank).astype(jnp.float32)                # [Kpad, Ti]
        # payload [8, Ti] . onehot [Kpad, Ti], contracting the lane axis of
        # both -> [8, Kpad] lane-dense output slab.
        out_ref[...] = jax.lax.dot_general(
            payload_ref[...], onehot,
            dimension_numbers=(((1,), (1,)), ((), ())),
            preferred_element_type=jnp.float32)


def boxlist_sort(boxes, scores, max_proposals, *, ti=512, tj=4096):
    """JAX/Pallas equivalent of BoxListSort.forward.

    boxes:  [N, 4] float
    scores: [N]    float
    Returns (boxes_out [K,4], scores_out [K], idx_out [K]) for
    K = max_proposals, or the inputs unchanged (plus arange(N)) if
    N <= max_proposals (static-shape stand-in for the PyTorch branch).
    """
    N = boxes.shape[0]
    if N <= max_proposals:
        return boxes, scores, jnp.arange(N, dtype=jnp.int32)
    if N >= (1 << 24):
        raise ValueError("boxlist_sort: indices travel through f32; "
                         "N must be < 2**24.")

    K = max_proposals
    Kpad = _round_up(K, 128)            # lane-dense output slab width

    # ---- tiling: multiples of 128, clamped to the padded problem size ------
    ti = max(128, _round_up(ti, 128))
    tj = max(ti, _round_up(tj, ti))     # keep Tj a multiple of Ti
    lane_n = _round_up(N, 128)
    if lane_n <= ti:
        Ti = Tj = lane_n
    elif lane_n <= tj:
        Ti, Tj = ti, _round_up(lane_n, ti)
    else:
        Ti, Tj = ti, tj
    N_pad = _round_up(N, Tj)            # Tj % Ti == 0  ->  N_pad % Ti == 0
    nb_i = N_pad // Ti
    nb_j = N_pad // Tj

    scores_f32 = scores.astype(jnp.float32)
    neg_inf = jnp.float32(-jnp.inf)
    # NaN scores would break rank uniqueness; canonicalize to -inf for
    # ranking.  (torch.topk treats NaN as largest -- documented divergence.)
    s_rank = jnp.where(jnp.isnan(scores_f32), neg_inf, scores_f32)
    s_row = jnp.full((1, N_pad), neg_inf, jnp.float32).at[0, :N].set(s_rank)

    # Fused lane-dense payload [8, N_pad]: boxes^T, original score, index.
    payload = jnp.zeros((8, N_pad), jnp.float32)
    payload = payload.at[0:4, :N].set(boxes.astype(jnp.float32).T)
    payload = payload.at[4, :N].set(scores_f32)
    payload = payload.at[5, :].set(jnp.arange(N_pad, dtype=jnp.float32))

    kernel = functools.partial(_rank_gather_kernel, Ti=Ti, Tj=Tj, Kpad=Kpad)
    partials = pl.pallas_call(
        kernel,
        out_shape=jax.ShapeDtypeStruct((nb_i, 8, Kpad), jnp.float32),
        grid_spec=pltpu.PrefetchScalarGridSpec(
            num_scalar_prefetch=0,
            grid=(nb_i, nb_j),                           # reduction axis last
            in_specs=[
                pl.BlockSpec((1, Ti), lambda ib, jb: (0, ib)),   # s_i (lane-dense)
                pl.BlockSpec((1, Tj), lambda ib, jb: (0, jb)),   # s_j (lane-dense)
                pl.BlockSpec((8, Ti), lambda ib, jb: (0, ib)),   # payload
            ],
            out_specs=pl.BlockSpec((None, 8, Kpad), lambda ib, jb: (ib, 0, 0)),
            scratch_shapes=[
                pltpu.VMEM((1, Ti), jnp.int32),        # rank accumulator
                pltpu.VMEM((Tj, 128), jnp.float32),    # transposed j scores
            ],
        ),
        compiler_params=pltpu.CompilerParams(
            dimension_semantics=("parallel", "arbitrary"),
            vmem_limit_bytes=32 * 1024 * 1024,
        ),
    )(s_row, s_row, payload)

    # Rank k < K is claimed by exactly one i-block; the rest contribute zeros.
    slab = jnp.sum(partials, axis=0)                   # [8, Kpad]
    out_boxes = slab[0:4, :K].T.astype(boxes.dtype)
    out_scores = slab[4, :K].astype(scores.dtype)
    out_idx = slab[5, :K].astype(jnp.int32)            # exact: N < 2**24
    return out_boxes, out_scores, out_idx


if __name__ == "__main__":
    key = jax.random.PRNGKey(0)
    kb1, ks1, kb2, ks2 = jax.random.split(key, 4)

    def check(boxes, scores, k, **tiles):
        sb, ss, si = boxlist_sort(boxes, scores, k, **tiles)
        jax.block_until_ready((sb, ss, si))
        rv, ri = jax.lax.top_k(scores, k)
        assert jnp.allclose(ss, rv, atol=1e-6), "scores mismatch"
        assert jnp.array_equal(si, ri.astype(jnp.int32)), "indices mismatch"
        assert jnp.allclose(sb, boxes[ri], atol=1e-6), "boxes mismatch"

    # --- small, single-block case -------------------------------------------
    n1, k1 = 200, 32
    boxes1 = jax.random.uniform(kb1, (n1, 4), dtype=jnp.float32) * 100.0
    scores1 = jax.random.uniform(ks1, (n1,), dtype=jnp.float32)
    check(boxes1, scores1, k1)

    # --- multi-i-block case with default tiling -----------------------------
    n2, k2 = 1000, 100
    boxes2 = jax.random.uniform(kb2, (n2, 4), dtype=jnp.float32) * 100.0
    scores2 = jax.random.uniform(ks2, (n2,), dtype=jnp.float32)
    check(boxes2, scores2, k2)

    # --- small tiles: exercises all three compare modes (before / after /
    #     overlap) and a Kpad > 128 lane-dense output slab --------------------
    check(boxes2, scores2, 130, ti=128, tj=256)

    # --- pass-through case (N <= max_proposals) ------------------------------
    pb, ps, pi = boxlist_sort(boxes1, scores1, 512)
    jax.block_until_ready((pb, ps, pi))
    assert pb.shape == (n1, 4) and ps.shape == (n1,)

    print("KERNEL_OK")
</pallas_src>

<mosaic_0001>
module attributes {stable_mosaic.version = 11 : i64} {
  func.func @_rank_gather_kernel(%arg0: i32, %arg1: i32, %arg2: memref<1x256xf32, #tpu.memory_space<vmem>>, %arg3: memref<1x256xf32, #tpu.memory_space<vmem>>, %arg4: memref<8x256xf32, #tpu.memory_space<vmem>>, %arg5: memref<1x8x128xf32, #tpu.memory_space<vmem>>, %arg6: memref<1x256xi32, #tpu.memory_space<vmem>>, %arg7: memref<256x128xf32, #tpu.memory_space<vmem>>) attributes {dimension_semantics = [#tpu.dimension_semantics<parallel>, #tpu.dimension_semantics<arbitrary>], iteration_bounds = array<i64: 1, 1>, scalar_prefetch = 0 : i64, scratch_operands = 2 : i64, tpu.core_type = #tpu.core_type<tc>, window_params = [{transform_indices = @transform_0, window_bounds = array<i64: 1, 256>}, {transform_indices = @transform_1, window_bounds = array<i64: 1, 256>}, {transform_indices = @transform_2, window_bounds = array<i64: 8, 256>}, {transform_indices = @transform_3, window_bounds = array<i64: 1, 8, 128>}]} {
    %c0_i32 = arith.constant 0 : i32
    %0 = arith.cmpi eq, %arg1, %c0_i32 : i32
    %1 = arith.extui %0 : i1 to i32
    %c0_i32_0 = arith.constant 0 : i32
    %2 = arith.cmpi ne, %1, %c0_i32_0 : i32
    scf.if %2 {
      %c0_i32_15 = arith.constant 0 : i32
      %30 = vector.broadcast %c0_i32_15 : i32 to vector<1x256xi32>
      %c0_16 = arith.constant 0 : index
      %c0_17 = arith.constant 0 : index
      %31 = vector.load %arg6[%c0_16, %c0_17] : memref<1x256xi32, #tpu.memory_space<vmem>>, vector<1x256xi32>
      tpu.vector_store %arg6[%c0_16, %c0_17], %30 {strides = array<i32>} : memref<1x256xi32, #tpu.memory_space<vmem>>, vector<1x256xi32>,
    } else {
    }
    %c0 = arith.constant 0 : index
    %c0_1 = arith.constant 0 : index
    %3 = vector.load %arg3[%c0, %c0_1] : memref<1x256xf32, #tpu.memory_space<vmem>>, vector<1x128xf32>
    %4 = vector.shape_cast %3 : vector<1x128xf32> to vector<1x128xf32>
    %5 = vector.broadcast %4 : vector<1x128xf32> to vector<128x128xf32>
    %6 = tpu.transpose %5, [1, 0] : vector<128x128xf32> -> vector<128x128xf32>
    %c0_2 = arith.constant 0 : index
    %c0_3 = arith.constant 0 : index
    %7 = vector.load %arg7[%c0_2, %c0_3] : memref<256x128xf32, #tpu.memory_space<vmem>>, vector<128x128xf32>
    tpu.vector_store %arg7[%c0_2, %c0_3], %6 {strides = array<i32>} : memref<256x128xf32, #tpu.memory_space<vmem>>, vector<128x128xf32>,
    %c0_4 = arith.constant 0 : index
    %c128 = arith.constant 128 : index
    %8 = vector.load %arg3[%c0_4, %c128] : memref<1x256xf32, #tpu.memory_space<vmem>>, vector<1x128xf32>
    %9 = vector.shape_cast %8 : vector<1x128xf32> to vector<1x128xf32>
    %10 = vector.broadcast %9 : vector<1x128xf32> to vector<128x128xf32>
    %11 = tpu.transpose %10, [1, 0] : vector<128x128xf32> -> vector<128x128xf32>
    %c128_5 = arith.constant 128 : index
    %c0_6 = arith.constant 0 : index
    %12 = vector.load %arg7[%c128_5, %c0_6] : memref<256x128xf32, #tpu.memory_space<vmem>>, vector<128x128xf32>
    tpu.vector_store %arg7[%c128_5, %c0_6], %11 {strides = array<i32>} : memref<256x128xf32, #tpu.memory_space<vmem>>, vector<128x128xf32>,
    %c256_i32 = arith.constant 256 : i32
    %13 = arith.muli %arg0, %c256_i32 : i32
    %c256_i32_7 = arith.constant 256 : i32
    %14 = arith.muli %arg1, %c256_i32_7 : i32
    %c256_i32_8 = arith.constant 256 : i32
    %15 = arith.addi %14, %c256_i32_8 : i32
    %16 = arith.cmpi sle, %15, %13 : i32
    %c256_i32_9 = arith.constant 256 : i32
    %17 = arith.addi %13, %c256_i32_9 : i32
    %18 = arith.cmpi sge, %14, %17 : i32
    %19 = arith.ori %16, %18 : i1
    %true = arith.constant true
    %20 = arith.xori %19, %true : i1
    %21 = arith.extui %16 : i1 to i32
    %c0_i32_10 = arith.constant 0 : i32
    %22 = arith.cmpi ne, %21, %c0_i32_10 : i32
    scf.if %22 {
      %c0_15 = arith.constant 0 : index
      %c0_16 = arith.constant 0 : index
      %30 = vector.load %arg2[%c0_15, %c0_16] : memref<1x256xf32, #tpu.memory_space<vmem>>, vector<1x128xf32>
      %31 = vector.shape_cast %30 : vector<1x128xf32> to vector<1x128xf32>
      %32 = vector.broadcast %31 : vector<1x128xf32> to vector<128x128xf32>
      %c0_i32_17 = arith.constant 0 : i32
      %33 = vector.broadcast %c0_i32_17 : i32 to vector<128x128xi32>
      %c0_i32_18 = arith.constant 0 : i32
      %c128_i32 = arith.constant 128 : i32
      %34 = arith.muli %c0_i32_18, %c128_i32 : i32
      %35 = tpu.assume_multiple %34, 128 : i32
      %36 = arith.index_cast %35 : i32 to index
      %c0_19 = arith.constant 0 : index
      %37 = vector.load %arg7[%36, %c0_19] : memref<256x128xf32, #tpu.memory_space<vmem>>, vector<128x128xf32>
      %38 = arith.cmpf oge, %37, %32 : vector<128x128xf32>
      %39 = arith.extui %38 : vector<128x128xi1> to vector<128x128xi32>
      %40 = arith.addi %33, %39 : vector<128x128xi32>
      %c1_i32 = arith.constant 1 : i32
      %c128_i32_20 = arith.constant 128 : i32
      %41 = arith.muli %c1_i32, %c128_i32_20 : i32
      %42 = tpu.assume_multiple %41, 128 : i32
      %43 = arith.index_cast %42 : i32 to index
      %c0_21 = arith.constant 0 : index
      %44 = vector.load %arg7[%43, %c0_21] : memref<256x128xf32, #tpu.memory_space<vmem>>, vector<128x128xf32>
      %45 = arith.cmpf oge, %44, %32 : vector<128x128xf32>
      %46 = arith.extui %45 : vector<128x128xi1> to vector<128x128xi32>
      %47 = arith.addi %40, %46 : vector<128x128xi32>
      %c2_i32 = arith.constant 2 : i32
      %c0_22 = arith.constant 0 : index
      %c0_23 = arith.constant 0 : index
      %48 = vector.load %arg6[%c0_22, %c0_23] : memref<1x256xi32, #tpu.memory_space<vmem>>, vector<1x128xi32>
      %cst = arith.constant dense<0> : vector<128xi32>
      %49 = vector.multi_reduction <add>, %47, %cst [0] : vector<128x128xi32> to vector<128xi32>
      %50 = vector.shape_cast %49 : vector<128xi32> to vector<1x128xi32>
      %51 = arith.addi %48, %50 : vector<1x128xi32>
      %c0_24 = arith.constant 0 : index
      %c0_25 = arith.constant 0 : index
      %52 = vector.load %arg6[%c0_24, %c0_25] : memref<1x256xi32, #tpu.memory_space<vmem>>, vector<1x128xi32>
      tpu.vector_store %arg6[%c0_24, %c0_25], %51 {strides = array<i32>} : memref<1x256xi32, #tpu.memory_space<vmem>>, vector<1x128xi32>,
      %c0_26 = arith.constant 0 : index
      %c128_27 = arith.constant 128 : index
      %53 = vector.load %arg2[%c0_26, %c128_27] : memref<1x256xf32, #tpu.memory_space<vmem>>, vector<1x128xf32>
      %54 = vector.shape_cast %53 : vector<1x128xf32> to vector<1x128xf32>
      %55 = vector.broadcast %54 : vector<1x128xf32> to vector<128x128xf32>
      %c0_i32_28 = arith.constant 0 : i32
      %56 = vector.broadcast %c0_i32_28 : i32 to vector<128x128xi32>
      %c0_i32_29 = arith.constant 0 : i32
      %c128_i32_30 = arith.constant 128 : i32
      %57 = arith.muli %c0_i32_29, %c128_i32_30 : i32
      %58 = tpu.assume_multiple %57, 128 : i32
      %59 = arith.index_cast %58 : i32 to index
      %c0_31 = arith.constant 0 : index
      %60 = vector.load %arg7[%59, %c0_31] : memref<256x128xf32, #tpu.memory_space<vmem>>, vector<128x128xf32>
      %61 = arith.cmpf oge, %60, %55 : vector<128x128xf32>
      %62 = arith.extui %61 : vector<128x128xi1> to vector<128x128xi32>
      %63 = arith.addi %56, %62 : vector<128x128xi32>
      %c1_i32_32 = arith.constant 1 : i32
      %c128_i32_33 = arith.constant 128 : i32
      %64 = arith.muli %c1_i32_32, %c128_i32_33 : i32
      %65 = tpu.assume_multiple %64, 128 : i32
      %66 = arith.index_cast %65 : i32 to index
      %c0_34 = arith.constant 0 : index
      %67 = vector.load %arg7[%66, %c0_34] : memref<256x128xf32, #tpu.memory_space<vmem>>, vector<128x128xf32>
      %68 = arith.cmpf oge, %67, %55 : vector<128x128xf32>
      %69 = arith.extui %68 : vector<128x128xi1> to vector<128x128xi32>
      %70 = arith.addi %63, %69 : vector<128x128xi32>
      %c2_i32_35 = arith.constant 2 : i32
      %c0_36 = arith.constant 0 : index
      %c128_37 = arith.constant 128 : index
      %71 = vector.load %arg6[%c0_36, %c128_37] : memref<1x256xi32, #tpu.memory_space<vmem>>, vector<1x128xi32>
      %cst_38 = arith.constant dense<0> : vector<128xi32>
      %72 = vector.multi_reduction <add>, %70, %cst_38 [0] : vector<128x128xi32> to vector<128xi32>
      %73 = vector.shape_cast %72 : vector<128xi32> to vector<1x128xi32>
      %74 = arith.addi %71, %73 : vector<1x128xi32>
      %c0_39 = arith.constant 0 : index
      %c128_40 = arith.constant 128 : index
      %75 = vector.load %arg6[%c0_39, %c128_40] : memref<1x256xi32, #tpu.memory_space<vmem>>, vector<1x128xi32>
      tpu.vector_store %arg6[%c0_39, %c128_40], %74 {strides = array<i32>} : memref<1x256xi32, #tpu.memory_space<vmem>>, vector<1x128xi32>,
    } else {
    }
    %23 = arith.extui %18 : i1 to i32
    %c0_i32_11 = arith.constant 0 : i32
    %24 = arith.cmpi ne, %23, %c0_i32_11 : i32
    scf.if %24 {
      %c0_15 = arith.constant 0 : index
      %c0_16 = arith.constant 0 : index
      %30 = vector.load %arg2[%c0_15, %c0_16] : memref<1x256xf32, #tpu.memory_space<vmem>>, vector<1x128xf32>
      %31 = vector.shape_cast %30 : vector<1x128xf32> to vector<1x128xf32>
      %32 = vector.broadcast %31 : vector<1x128xf32> to vector<128x128xf32>
      %c0_i32_17 = arith.constant 0 : i32
      %33 = vector.broadcast %c0_i32_17 : i32 to vector<128x128xi32>
      %c0_i32_18 = arith.constant 0 : i32
      %c128_i32 = arith.constant 128 : i32
      %34 = arith.muli %c0_i32_18, %c128_i32 : i32
      %35 = tpu.assume_multiple %34, 128 : i32
      %36 = arith.index_cast %35 : i32 to index
      %c0_19 = arith.constant 0 : index
      %37 = vector.load %arg7[%36, %c0_19] : memref<256x128xf32, #tpu.memory_space<vmem>>, vector<128x128xf32>
      %38 = arith.cmpf ogt, %37, %32 : vector<128x128xf32>
      %39 = arith.extui %38 : vector<128x128xi1> to vector<128x128xi32>
      %40 = arith.addi %33, %39 : vector<128x128xi32>
      %c1_i32 = arith.constant 1 : i32
      %c128_i32_20 = arith.constant 128 : i32
      %41 = arith.muli %c1_i32, %c128_i32_20 : i32
      %42 = tpu.assume_multiple %41, 128 : i32
      %43 = arith.index_cast %42 : i32 to index
      %c0_21 = arith.constant 0 : index
      %44 = vector.load %arg7[%43, %c0_21] : memref<256x128xf32, #tpu.memory_space<vmem>>, vector<128x128xf32>
      %45 = arith.cmpf ogt, %44, %32 : vector<128x128xf32>
      %46 = arith.extui %45 : vector<128x128xi1> to vector<128x128xi32>
      %47 = arith.addi %40, %46 : vector<128x128xi32>
      %c2_i32 = arith.constant 2 : i32
      %c0_22 = arith.constant 0 : index
      %c0_23 = arith.constant 0 : index
      %48 = vector.load %arg6[%c0_22, %c0_23] : memref<1x256xi32, #tpu.memory_space<vmem>>, vector<1x128xi32>
      %cst = arith.constant dense<0> : vector<128xi32>
      %49 = vector.multi_reduction <add>, %47, %cst [0] : vector<128x128xi32> to vector<128xi32>
      %50 = vector.shape_cast %49 : vector<128xi32> to vector<1x128xi32>
      %51 = arith.addi %48, %50 : vector<1x128xi32>
      %c0_24 = arith.constant 0 : index
      %c0_25 = arith.constant 0 : index
      %52 = vector.load %arg6[%c0_24, %c0_25] : memref<1x256xi32, #tpu.memory_space<vmem>>, vector<1x128xi32>
      tpu.vector_store %arg6[%c0_24, %c0_25], %51 {strides = array<i32>} : memref<1x256xi32, #tpu.memory_space<vmem>>, vector<1x128xi32>,
      %c0_26 = arith.constant 0 : index
      %c128_27 = arith.constant 128 : index
      %53 = vector.load %arg2[%c0_26, %c128_27] : memref<1x256xf32, #tpu.memory_space<vmem>>, vector<1x128xf32>
      %54 = vector.shape_cast %53 : vector<1x128xf32> to vector<1x128xf32>
      %55 = vector.broadcast %54 : vector<1x128xf32> to vector<128x128xf32>
      %c0_i32_28 = arith.constant 0 : i32
      %56 = vector.broadcast %c0_i32_28 : i32 to vector<128x128xi32>
      %c0_i32_29 = arith.constant 0 : i32
      %c128_i32_30 = arith.constant 128 : i32
      %57 = arith.muli %c0_i32_29, %c128_i32_30 : i32
      %58 = tpu.assume_multiple %57, 128 : i32
      %59 = arith.index_cast %58 : i32 to index
      %c0_31 = arith.constant 0 : index
      %60 = vector.load %arg7[%59, %c0_31] : memref<256x128xf32, #tpu.memory_space<vmem>>, vector<128x128xf32>
      %61 = arith.cmpf ogt, %60, %55 : vector<128x128xf32>
      %62 = arith.extui %61 : vector<128x128xi1> to vector<128x128xi32>
      %63 = arith.addi %56, %62 : vector<128x128xi32>
      %c1_i32_32 = arith.constant 1 : i32
      %c128_i32_33 = arith.constant 128 : i32
      %64 = arith.muli %c1_i32_32, %c128_i32_33 : i32
      %65 = tpu.assume_multiple %64, 128 : i32
      %66 = arith.index_cast %65 : i32 to index
      %c0_34 = arith.constant 0 : index
      %67 = vector.load %arg7[%66, %c0_34] : memref<256x128xf32, #tpu.memory_space<vmem>>, vector<128x128xf32>
      %68 = arith.cmpf ogt, %67, %55 : vector<128x128xf32>
      %69 = arith.extui %68 : vector<128x128xi1> to vector<128x128xi32>
      %70 = arith.addi %63, %69 : vector<128x128xi32>
      %c2_i32_35 = arith.constant 2 : i32
      %c0_36 = arith.constant 0 : index
      %c128_37 = arith.constant 128 : index
      %71 = vector.load %arg6[%c0_36, %c128_37] : memref<1x256xi32, #tpu.memory_space<vmem>>, vector<1x128xi32>
      %cst_38 = arith.constant dense<0> : vector<128xi32>
      %72 = vector.multi_reduction <add>, %70, %cst_38 [0] : vector<128x128xi32> to vector<128xi32>
      %73 = vector.shape_cast %72 : vector<128xi32> to vector<1x128xi32>
      %74 = arith.addi %71, %73 : vector<1x128xi32>
      %c0_39 = arith.constant 0 : index
      %c128_40 = arith.constant 128 : index
      %75 = vector.load %arg6[%c0_39, %c128_40] : memref<1x256xi32, #tpu.memory_space<vmem>>, vector<1x128xi32>
      tpu.vector_store %arg6[%c0_39, %c128_40], %74 {strides = array<i32>} : memref<1x256xi32, #tpu.memory_space<vmem>>, vector<1x128xi32>,
    } else {
    }
    %25 = arith.extui %20 : i1 to i32
    %c0_i32_12 = arith.constant 0 : i32
    %26 = arith.cmpi ne, %25, %c0_i32_12 : i32
    scf.if %26 {
      %30 = tpu.iota {dimensions = array<i32: 0>} : vector<128x128xi32>
      %31 = tpu.iota {dimensions = array<i32: 1>} : vector<128x128xi32>
      %32 = arith.subi %30, %31 : vector<128x128xi32>
      %c0_15 = arith.constant 0 : index
      %c0_16 = arith.constant 0 : index
      %33 = vector.load %arg2[%c0_15, %c0_16] : memref<1x256xf32, #tpu.memory_space<vmem>>, vector<1x128xf32>
      %34 = vector.shape_cast %33 : vector<1x128xf32> to vector<1x128xf32>
      %35 = vector.broadcast %34 : vector<1x128xf32> to vector<128x128xf32>
      %c0_i32_17 = arith.constant 0 : i32
      %36 = arith.addi %13, %c0_i32_17 : i32
      %37 = arith.subi %14, %36 : i32
      %c0_i32_18 = arith.constant 0 : i32
      %38 = vector.broadcast %c0_i32_18 : i32 to vector<128x128xi32>
      %c0_i32_19 = arith.constant 0 : i32
      %c128_i32 = arith.constant 128 : i32
      %39 = arith.muli %c0_i32_19, %c128_i32 : i32
      %40 = tpu.assume_multiple %39, 128 : i32
      %41 = arith.index_cast %40 : i32 to index
      %c0_20 = arith.constant 0 : index
      %42 = vector.load %arg7[%41, %c0_20] : memref<256x128xf32, #tpu.memory_space<vmem>>, vector<128x128xf32>
      %c128_i32_21 = arith.constant 128 : i32
      %43 = arith.muli %c0_i32_19, %c128_i32_21 : i32
      %44 = arith.addi %37, %43 : i32
      %45 = vector.broadcast %44 : i32 to vector<128x128xi32>
      %46 = arith.addi %32, %45 : vector<128x128xi32>
      %c0_i32_22 = arith.constant 0 : i32
      %47 = vector.broadcast %c0_i32_22 : i32 to vector<128x128xi32>
      %48 = arith.cmpi slt, %46, %47 : vector<128x128xi32>
      %49 = arith.cmpf ogt, %42, %35 : vector<128x128xf32>
      %50 = arith.cmpf oeq, %42, %35 : vector<128x128xf32>
      %51 = arith.andi %50, %48 : vector<128x128xi1>
      %52 = arith.ori %49, %51 : vector<128x128xi1>
      %53 = arith.extui %52 : vector<128x128xi1> to vector<128x128xi32>
      %54 = arith.addi %38, %53 : vector<128x128xi32>
      %c1_i32 = arith.constant 1 : i32
      %c128_i32_23 = arith.constant 128 : i32
      %55 = arith.muli %c1_i32, %c128_i32_23 : i32
      %56 = tpu.assume_multiple %55, 128 : i32
      %57 = arith.index_cast %56 : i32 to index
      %c0_24 = arith.constant 0 : index
      %58 = vector.load %arg7[%57, %c0_24] : memref<256x128xf32, #tpu.memory_space<vmem>>, vector<128x128xf32>
      %c128_i32_25 = arith.constant 128 : i32
      %59 = arith.muli %c1_i32, %c128_i32_25 : i32
      %60 = arith.addi %37, %59 : i32
      %61 = vector.broadcast %60 : i32 to vector<128x128xi32>
      %62 = arith.addi %32, %61 : vector<128x128xi32>
      %c0_i32_26 = arith.constant 0 : i32
      %63 = vector.broadcast %c0_i32_26 : i32 to vector<128x128xi32>
      %64 = arith.cmpi slt, %62, %63 : vector<128x128xi32>
      %65 = arith.cmpf ogt, %58, %35 : vector<128x128xf32>
      %66 = arith.cmpf oeq, %58, %35 : vector<128x128xf32>
      %67 = arith.andi %66, %64 : vector<128x128xi1>
      %68 = arith.ori %65, %67 : vector<128x128xi1>
      %69 = arith.extui %68 : vector<128x128xi1> to vector<128x128xi32>
      %70 = arith.addi %54, %69 : vector<128x128xi32>
      %c2_i32 = arith.constant 2 : i32
      %c0_27 = arith.constant 0 : index
      %c0_28 = arith.constant 0 : index
      %71 = vector.load %arg6[%c0_27, %c0_28] : memref<1x256xi32, #tpu.memory_space<vmem>>, vector<1x128xi32>
      %cst = arith.constant dense<0> : vector<128xi32>
      %72 = vector.multi_reduction <add>, %70, %cst [0] : vector<128x128xi32> to vector<128xi32>
      %73 = vector.shape_cast %72 : vector<128xi32> to vector<1x128xi32>
      %74 = arith.addi %71, %73 : vector<1x128xi32>
      %c0_29 = arith.constant 0 : index
      %c0_30 = arith.constant 0 : index
      %75 = vector.load %arg6[%c0_29, %c0_30] : memref<1x256xi32, #tpu.memory_space<vmem>>, vector<1x128xi32>
      tpu.vector_store %arg6[%c0_29, %c0_30], %74 {strides = array<i32>} : memref<1x256xi32, #tpu.memory_space<vmem>>, vector<1x128xi32>,
      %c0_31 = arith.constant 0 : index
      %c128_32 = arith.constant 128 : index
      %76 = vector.load %arg2[%c0_31, %c128_32] : memref<1x256xf32, #tpu.memory_space<vmem>>, vector<1x128xf32>
      %77 = vector.shape_cast %76 : vector<1x128xf32> to vector<1x128xf32>
      %78 = vector.broadcast %77 : vector<1x128xf32> to vector<128x128xf32>
      %c128_i32_33 = arith.constant 128 : i32
      %79 = arith.addi %13, %c128_i32_33 : i32
      %80 = arith.subi %14, %79 : i32
      %c0_i32_34 = arith.constant 0 : i32
      %81 = vector.broadcast %c0_i32_34 : i32 to vector<128x128xi32>
      %c0_i32_35 = arith.constant 0 : i32
      %c128_i32_36 = arith.constant 128 : i32
      %82 = arith.muli %c0_i32_35, %c128_i32_36 : i32
      %83 = tpu.assume_multiple %82, 128 : i32
      %84 = arith.index_cast %83 : i32 to index
      %c0_37 = arith.constant 0 : index
      %85 = vector.load %arg7[%84, %c0_37] : memref<256x128xf32, #tpu.memory_space<vmem>>, vector<128x128xf32>
      %c128_i32_38 = arith.constant 128 : i32
      %86 = arith.muli %c0_i32_35, %c128_i32_38 : i32
      %87 = arith.addi %80, %86 : i32
      %88 = vector.broadcast %87 : i32 to vector<128x128xi32>
      %89 = arith.addi %32, %88 : vector<128x128xi32>
      %c0_i32_39 = arith.constant 0 : i32
      %90 = vector.broadcast %c0_i32_39 : i32 to vector<128x128xi32>
      %91 = arith.cmpi slt, %89, %90 : vector<128x128xi32>
      %92 = arith.cmpf ogt, %85, %78 : vector<128x128xf32>
      %93 = arith.cmpf oeq, %85, %78 : vector<128x128xf32>
      %94 = arith.andi %93, %91 : vector<128x128xi1>
      %95 = arith.ori %92, %94 : vector<128x128xi1>
      %96 = arith.extui %95 : vector<128x128xi1> to vector<128x128xi32>
      %97 = arith.addi %81, %96 : vector<128x128xi32>
      %c1_i32_40 = arith.constant 1 : i32
      %c128_i32_41 = arith.constant 128 : i32
      %98 = arith.muli %c1_i32_40, %c128_i32_41 : i32
      %99 = tpu.assume_multiple %98, 128 : i32
      %100 = arith.index_cast %99 : i32 to index
      %c0_42 = arith.constant 0 : index
      %101 = vector.load %arg7[%100, %c0_42] : memref<256x128xf32, #tpu.memory_space<vmem>>, vector<128x128xf32>
      %c128_i32_43 = arith.constant 128 : i32
      %102 = arith.muli %c1_i32_40, %c128_i32_43 : i32
      %103 = arith.addi %80, %102 : i32
      %104 = vector.broadcast %103 : i32 to vector<128x128xi32>
      %105 = arith.addi %32, %104 : vector<128x128xi32>
      %c0_i32_44 = arith.constant 0 : i32
      %106 = vector.broadcast %c0_i32_44 : i32 to vector<128x128xi32>
      %107 = arith.cmpi slt, %105, %106 : vector<128x128xi32>
      %108 = arith.cmpf ogt, %101, %78 : vector<128x128xf32>
      %109 = arith.cmpf oeq, %101, %78 : vector<128x128xf32>
      %110 = arith.andi %109, %107 : vector<128x128xi1>
      %111 = arith.ori %108, %110 : vector<128x128xi1>
      %112 = arith.extui %111 : vector<128x128xi1> to vector<128x128xi32>
      %113 = arith.addi %97, %112 : vector<128x128xi32>
      %c2_i32_45 = arith.constant 2 : i32
      %c0_46 = arith.constant 0 : index
      %c128_47 = arith.constant 128 : index
      %114 = vector.load %arg6[%c0_46, %c128_47] : memref<1x256xi32, #tpu.memory_space<vmem>>, vector<1x128xi32>
      %cst_48 = arith.constant dense<0> : vector<128xi32>
      %115 = vector.multi_reduction <add>, %113, %cst_48 [0] : vector<128x128xi32> to vector<128xi32>
      %116 = vector.shape_cast %115 : vector<128xi32> to vector<1x128xi32>
      %117 = arith.addi %114, %116 : vector<1x128xi32>
      %c0_49 = arith.constant 0 : index
      %c128_50 = arith.constant 128 : index
      %118 = vector.load %arg6[%c0_49, %c128_50] : memref<1x256xi32, #tpu.memory_space<vmem>>, vector<1x128xi32>
      tpu.vector_store %arg6[%c0_49, %c128_50], %117 {strides = array<i32>} : memref<1x256xi32, #tpu.memory_space<vmem>>, vector<1x128xi32>,
    } else {
    }
    %c0_i32_13 = arith.constant 0 : i32
    %27 = arith.cmpi eq, %arg1, %c0_i32_13 : i32
    %28 = arith.extui %27 : i1 to i32
    %c0_i32_14 = arith.constant 0 : i32
    %29 = arith.cmpi ne, %28, %c0_i32_14 : i32
    scf.if %29 {
      %c0_15 = arith.constant 0 : index
      %c0_16 = arith.constant 0 : index
      %30 = vector.load %arg6[%c0_15, %c0_16] : memref<1x256xi32, #tpu.memory_space<vmem>>, vector<1x256xi32>
      %31 = tpu.iota {dimensions = array<i32: 0>} : vector<128x256xi32>
      %32 = vector.broadcast %30 : vector<1x256xi32> to vector<128x256xi32>
      %33 = arith.cmpi eq, %31, %32 : vector<128x256xi32>
      %34 = arith.extui %33 : vector<128x256xi1> to vector<128x256xi32>
      %35 = arith.sitofp %34 : vector<128x256xi32> to vector<128x256xf32>
      %c0_17 = arith.constant 0 : index
      %c0_18 = arith.constant 0 : index
      %36 = vector.load %arg4[%c0_17, %c0_18] : memref<8x256xf32, #tpu.memory_space<vmem>>, vector<8x256xf32>
      %cst = arith.constant dense<0.000000e+00> : vector<8x128xf32>
      %37 = tpu.matmul %36, %35, %cst {dimension_numbers = #tpu.dot_dimension_numbers<[1], [1], [0], [0], [0, 0, 1, 0], [], []>} : vector<8x256xf32>, vector<128x256xf32>, vector<8x128xf32> -> vector<8x128xf32>
      %c0_19 = arith.constant 0 : index
      %c0_20 = arith.constant 0 : index
      %c0_21 = arith.constant 0 : index
      %38 = vector.load %arg5[%c0_19, %c0_20, %c0_21] : memref<1x8x128xf32, #tpu.memory_space<vmem>>, vector<1x8x128xf32>
      %39 = vector.shape_cast %38 : vector<1x8x128xf32> to vector<8x128xf32>
      %40 = vector.shape_cast %37 : vector<8x128xf32> to vector<1x8x128xf32>
      tpu.vector_store %arg5[%c0_19, %c0_20, %c0_21], %40 {strides = array<i32>} : memref<1x8x128xf32, #tpu.memory_space<vmem>>, vector<1x8x128xf32>,
    } else {
    }
    return
  }
  func.func @transform_0(%arg0: i32, %arg1: i32) -> (i32, i32) {
    %c0_i32 = arith.constant 0 : i32
    %c0_i32_0 = arith.constant 0 : i32
    return %c0_i32, %arg0 : i32, i32
  }
  func.func @transform_1(%arg0: i32, %arg1: i32) -> (i32, i32) {
    %c0_i32 = arith.constant 0 : i32
    %c0_i32_0 = arith.constant 0 : i32
    return %c0_i32, %arg1 : i32, i32
  }
  func.func @transform_2(%arg0: i32, %arg1: i32) -> (i32, i32) {
    %c0_i32 = arith.constant 0 : i32
    %c0_i32_0 = arith.constant 0 : i32
    return %c0_i32, %arg0 : i32, i32
  }
  func.func @transform_3(%arg0: i32, %arg1: i32) -> (i32, i32, i32) {
    %c0_i32 = arith.constant 0 : i32
    %c0_i32_0 = arith.constant 0 : i32
    %c0_i32_1 = arith.constant 0 : i32
    return %arg0, %c0_i32, %c0_i32_0 : i32, i32, i32
  }
}

</mosaic_0001>

<bundles_post_ra>
// kernel: tpu_custom_call.1
= control target key start
LH: loop header
LB: loop body
LE: loop exit
PB: predicated region body
PF: predicated region fallthrough
CT: control target
= control target key end

     0   :  { %8 = vsyncpa [#allocation5], 0  ;;  %s3075_s0 = inlined_call_operand.hbm [shape: f32[1,256], index: 0, kind: input, shape index: {}]   ;;  %s3076_s1 = inlined_call_operand.vmem [shape: f32[1,256], index: 1, kind: input, shape index: {}]   ;;  %s3077_s2 = inlined_call_operand.hbm [shape: f32[8,256], index: 2, kind: input, shape index: {}]   ;;  %s3078_s3 = inlined_call_operand.hbm [shape: f32[1,8,128], index: 3, kind: output, shape index: {}]  }
   0x1   :  { %9 = vsyncpa [#allocation8], 0 }
   0x2   :  { %10 = vsyncpa [#allocation6], 0  ;;  %s1806_s12 = smov [#allocation4]   ;;  %s1807_s14 = smov [#allocation7]  }
   0x3   :  { %s17_s13 = sshll.u32 %s1806_s12, 4  ;;  %s29_s15 = sshll.u32 %s1807_s14, 4  ;;  %s18_s13 = int_to_ptr.vmem [resolvable:$true] %s17_s13  ;;  %s30_s15 = int_to_ptr.vmem [resolvable:$true] %s29_s15 }
   0x4   :  { %s1734_s18 = scalar_lea.hbm %s3075_s0, 32 }
   0x5   :  { %p1735_p0 = scmp.ne.s32.totalorder %s3075_s0, %s1734_s18  ;;  %p1738_p1 = scmp.lt.u32.totalorder %s1734_s18, %s3075_s0 }
   0x7   :  { %p1740_p2 = pnand %p1738_p1, %p1735_p0 }
   0x9   :  { %1743 = shalt.err (!%p1740_p2)
}
   0xa   :  { %s1744_s23 = scalar_lea.vmem %s18_s13, 32  ;;  %p1749_p4 = scmp.lt.s32.totalorder %s18_s13, %s18_s13 }
   0xb   :  { %p1745_p3 = scmp.ne.s32.totalorder %s18_s13, %s1744_s23  ;;  %p1750_p5 = scmp.lt.s32.totalorder %s1744_s23, %s1744_s23 }
   0xd   :  { %p1751_p6 = por %p1750_p5, %p1749_p4 }
   0xf   :  { %p1752_p7 = pnand %p1751_p6, %p1745_p3 }
  0x11   :  { %1755 = shalt.err (!%p1752_p7)
}
  0x12   :  { %20 = dma.hbm_to_vmem [thread:$0]  %s3075_s0, 32, %s18_s13, [#allocation5]  }
  0x13   :  { %s1756_s28 = scalar_lea.hbm %s3077_s2, 256 }
  0x14   :  { %p1757_p8 = scmp.ne.s32.totalorder %s3077_s2, %s1756_s28  ;;  %p1760_p9 = scmp.lt.u32.totalorder %s1756_s28, %s3077_s2 }
  0x16   :  { %p1762_p10 = pnand %p1760_p9, %p1757_p8 }
  0x18   :  { %1765 = shalt.err (!%p1762_p10)
}
  0x19   :  { %s1766_s6 = scalar_lea.vmem %s30_s15, 256  ;;  %p1771_p12 = scmp.lt.s32.totalorder %s30_s15, %s30_s15 }
  0x1a   :  { %p1767_p11 = scmp.ne.s32.totalorder %s30_s15, %s1766_s6  ;;  %p1772_p13 = scmp.lt.s32.totalorder %s1766_s6, %s1766_s6 }
  0x1c   :  { %p1773_p0 = por %p1772_p13, %p1771_p12 }
  0x1e   :  { %p1774_p1 = pnand %p1773_p0, %p1767_p11 }
  0x20   :  { %1777 = shalt.err (!%p1774_p1)
}
  0x21   :  { %32 = dma.hbm_to_vmem [thread:$0]  %s3077_s2, 256, %s30_s15, [#allocation8]  }
  0x22   :  { %1800 = dma.done.wait [#allocation5], 32  }
  0x23   :  { %1801 = vsyncadd [#allocation5], 4294967264 }
  0x24   :  { %1802 = dma.done.wait [#allocation8], 256  }
  0x25   :  { %1803 = vsyncadd [#allocation8], 4294967040  ;;  %v1626_v0 = vld [vmem:[%s3076_s1 + $0x1] ss:$0 sm:$0xff]  ;;  %v1625_v1 = vld [vmem:[%s3076_s1] ss:$0 sm:$0xff]  ;;  %v3082_v2 = vlaneseq }
  0x26   :  { %110 = vxpose.xlu1.b32.start [1/16] %v1626_v0, 128  ;;  %55 = vxpose.xlu0.b32.start [1/16] %v1625_v1, 128  ;;  %v1808_v3 = vmov 0   ;;  %v1880_v13 = vld [vmem:[#allocation4 + $0x1] ss:$0 sm:$0xff]  ;;  %v1884_v15 = vld [vmem:[#allocation4] ss:$0 sm:$0xff]  ;;  %v3095_v32 = vmov 0 }
  0x27   :  { %vm45_vm0 = vcmp.lt.s32.totalorder %v3082_v2, 256  ;;  %v1866_v6 = vshrl.u32 %v3082_v2, 7  ;;  %v1869_v7 = vand.u32 127, %v3082_v2  ;;  %v3114_v52 = vmov 0  ;;  %s1810_s1 = smov [#allocation9]  }
  0x28   :  { %47 = vst.msk [vmem:[#allocation2] sm:$0x3] %vm45_vm0, %v1808_v3  ;;  %v3118_v57 = vmov 0  ;;  %v3122_v62 = vmov 0  ;;  %v3124_v63 = vmov 0  ;;  %v3262_v58 = vmov 0 }
  0x29   :  { %v1874_v10 = vadd.s32 8, %v1866_v6  ;;  %v775_v11 = vsub.s32 %v1866_v6, %v1869_v7  ;;  %v1889_v17 = vadd.s32 16, %v1866_v6  ;;  %v1894_v18 = vadd.s32 24, %v1866_v6  ;;  %s1615_s2 = sshll.u32 %s1810_s1, 4  ;;  %s1616_s2 = int_to_ptr.vmem [resolvable:$true] %s1615_s2 }
  0x2a   :  { %111 = vxpose.xlu1.b32.cont [2/16] %v1626_v0, 128  ;;  %56 = vxpose.xlu0.b32.cont [2/16] %v1625_v1, 128  ;;  %v1922_v26 = vadd.s32 32, %v1866_v6  ;;  %v1927_v28 = vadd.s32 40, %v1866_v6  ;;  %v1949_v31 = vadd.s32 48, %v1866_v6  ;;  %v2004_v43 = vadd.s32 56, %v1866_v6  ;;  %s1778_s12 = scalar_lea.vmem %s1616_s2, 128  ;;  %p1783_p3 = scmp.lt.s32.totalorder %s1616_s2, %s1616_s2 }
  0x2b   :  { %v776_v16 = vsub.s32 %v1874_v10, %v1869_v7  ;;  %vm832_vm1 = vcmp.lt.s32.totalorder %v775_v11, 0  ;;  %v777_v22 = vsub.s32 %v1889_v17, %v1869_v7  ;;  %v778_v25 = vsub.s32 %v1894_v18, %v1869_v7  ;;  %p1779_p2 = scmp.ne.s32.totalorder %s1616_s2, %s1778_s12  ;;  %p1784_p4 = scmp.lt.s32.totalorder %s1778_s12, %s1778_s12 }
  0x2c   :  { %v779_v37 = vsub.s32 %v1922_v26, %v1869_v7  ;;  %v780_v41 = vsub.s32 %v1927_v28, %v1869_v7  ;;  %v2007_v44 = vadd.s32 64, %v1866_v6  ;;  %v781_v46 = vsub.s32 %v1949_v31, %v1869_v7 }
  0x2d   :  { %vm1901_vm4 = vcmp.lt.s32.totalorder %v776_v16, 0  ;;  %v2023_v47 = vadd.s32 72, %v1866_v6  ;;  %v2026_v48 = vadd.s32 80, %v1866_v6  ;;  %v2041_v50 = vadd.s32 88, %v1866_v6  ;;  %p1785_p5 = por %p1784_p4, %p1783_p3 }
  0x2e   :  { %112 = vxpose.xlu1.b32.cont [3/16] %v1626_v0, 128  ;;  %57 = vxpose.xlu0.b32.cont [3/16] %v1625_v1, 128  ;;  %v2044_v51 = vadd.s32 96, %v1866_v6  ;;  %v2064_v55 = vadd.s32 104, %v1866_v6  ;;  %v2067_v56 = vadd.s32 112, %v1866_v6  ;;  %v782_v60 = vsub.s32 %v2004_v43, %v1869_v7 }
  0x2f   :  { %v783_v61 = vsub.s32 %v2007_v44, %v1869_v7  ;;  %v2147_v23 = vadd.s32 120, %v1866_v6  ;;  %p1786_p6 = pnand %p1785_p5, %p1779_p2 }
  0x30   :  { %v787_v11 = vsub.s32 %v2044_v51, %v1869_v7  ;;  %v788_v21 = vsub.s32 %v2064_v55, %v1869_v7 }
  0x32   :  { %113 = vxpose.xlu1.b32.cont [4/16] %v1626_v0, 128  ;;  %58 = vxpose.xlu0.b32.cont [4/16] %v1625_v1, 128 }
  0x36   :  { %114 = vxpose.xlu1.b32.cont [5/16] %v1626_v0, 128  ;;  %59 = vxpose.xlu0.b32.cont [5/16] %v1625_v1, 128 }
  0x3a   :  { %115 = vxpose.xlu1.b32.cont [6/16] %v1626_v0, 128  ;;  %60 = vxpose.xlu0.b32.cont [6/16] %v1625_v1, 128 }
  0x3e   :  { %116 = vxpose.xlu1.b32.cont [7/16] %v1626_v0, 128  ;;  %61 = vxpose.xlu0.b32.cont [7/16] %v1625_v1, 128 }
  0x42   :  { %117 = vxpose.xlu1.b32.cont [8/16] %v1626_v0, 128  ;;  %62 = vxpose.xlu0.b32.cont [8/16] %v1625_v1, 128 }
  0x46   :  { %118 = vxpose.xlu1.b32.cont [9/16] %v1626_v0, 128  ;;  %63 = vxpose.xlu0.b32.cont [9/16] %v1625_v1, 128 }
  0x4a   :  { %119 = vxpose.xlu1.b32.cont [10/16] %v1626_v0, 128  ;;  %64 = vxpose.xlu0.b32.cont [10/16] %v1625_v1, 128 }
  0x4e   :  { %120 = vxpose.xlu1.b32.cont [11/16] %v1626_v0, 128  ;;  %65 = vxpose.xlu0.b32.cont [11/16] %v1625_v1, 128 }
  0x52   :  { %121 = vxpose.xlu1.b32.cont [12/16] %v1626_v0, 128  ;;  %66 = vxpose.xlu0.b32.cont [12/16] %v1625_v1, 128 }
  0x56   :  { %122 = vxpose.xlu1.b32.cont [13/16] %v1626_v0, 128  ;;  %67 = vxpose.xlu0.b32.cont [13/16] %v1625_v1, 128 }
  0x5a   :  { %123 = vxpose.xlu1.b32.cont [14/16] %v1626_v0, 128  ;;  %68 = vxpose.xlu0.b32.cont [14/16] %v1625_v1, 128 }
  0x5e   :  { %124 = vxpose.xlu1.b32.cont [15/16] %v1626_v0, 128  ;;  %69 = vxpose.xlu0.b32.cont [15/16] %v1625_v1, 128 }
  0x62   :  { %125 = vxpose.xlu1.b32.end [16/16] %v1626_v0, 128  ;;  %70 = vxpose.xlu0.b32.end [16/16] %v1625_v1, 128  ;;  %v784_v0 = vsub.s32 %v2023_v47, %v1869_v7  ;;  %v785_v1 = vsub.s32 %v2026_v48, %v1869_v7 }
  0xa6   :  { %v1863_v4 = vpop.trf.xlu1  ;;  %v71_v5 = vpop.trf.xlu0 }
  0xa7   :  { %vm1307_vm2 = vcmp.eq.f32.partialorder %v1863_v4, %v1880_v13  ;;  %vm864_vm3 = vcmp.eq.f32.partialorder %v71_v5, %v1884_v15  ;;  %vm848_vm8 = vcmp.gt.f32.partialorder %v71_v5, %v1884_v15  ;;  %vm1291_vm10 = vcmp.gt.f32.partialorder %v1863_v4, %v1880_v13 }
  0xa8   :  { %vm1909_vm6 = vmand %vm1307_vm2, %vm832_vm1  ;;  %vm1161_vm11 = vcmp.gt.f32.partialorder %v71_v5, %v1880_v13  ;;  %vm1177_vm12 = vcmp.eq.f32.partialorder %v71_v5, %v1880_v13 }
  0xa9   :  { %vm1915_vm9 = vmand %vm864_vm3, %vm832_vm1  ;;  %vm1942_vm1 = vcmp.lt.s32.totalorder %v777_v22, 0  ;;  %v789_v22 = vsub.s32 %v2067_v56, %v1869_v7 }
  0xaa   :  { %v1871_v8 = vpop.trf.xlu1  ;;  %v72_v9 = vpop.trf.xlu0  ;;  %vm1955_vm3 = vmor %vm848_vm8, %vm1915_vm9 }
  0xab   :  { %vm1308_vm5 = vcmp.eq.f32.partialorder %v1871_v8, %v1880_v13  ;;  %vm865_vm7 = vcmp.eq.f32.partialorder %v72_v9, %v1884_v15  ;;  %vm1292_vm13 = vcmp.gt.f32.partialorder %v1871_v8, %v1880_v13  ;;  %v3096_v32 = vsel %vm1955_vm3, 4294967295, %v3095_v32 }
  0xac   :  { %vm1324_vm14 = vmand %vm1308_vm5, %vm1901_vm4  ;;  %vm1162_vm8 = vcmp.gt.f32.partialorder %v72_v9, %v1880_v13  ;;  %vm1178_vm9 = vcmp.eq.f32.partialorder %v72_v9, %v1880_v13  ;;  %vm1977_vm3 = vcmp.lt.s32.totalorder %v778_v25, 0 }
  0xad   :  { %vm881_vm0 = vmand %vm865_vm7, %vm1901_vm4 }
  0xae   :  { %v1878_v12 = vpop.trf.xlu1  ;;  %v1882_v14 = vpop.trf.xlu0  ;;  %vm1963_vm5 = vmor %vm1291_vm10, %vm1909_vm6  ;;  %vm3105_vm6 = vcmp.gt.f32.partialorder %v72_v9, %v1884_v15  ;;  %v786_v9 = vsub.s32 %v2041_v50, %v1869_v7 }
  0xaf   :  { %vm1309_vm2 = vcmp.eq.f32.partialorder %v1878_v12, %v1880_v13  ;;  %vm866_vm4 = vcmp.eq.f32.partialorder %v1882_v14, %v1884_v15  ;;  %vm1967_vm7 = vmor %vm1161_vm11, %vm1177_vm12  ;;  %vm1293_vm11 = vcmp.gt.f32.partialorder %v1878_v12, %v1880_v13  ;;  %v1355_v40 = vsel %vm1963_vm5, 1, %v1808_v3 }
  0xb0   :  { %vm1971_vm15 = vmor %vm1292_vm13, %vm1324_vm14  ;;  %vm850_vm13 = vcmp.gt.f32.partialorder %v1882_v14, %v1884_v15 }
  0xb1   :  { %vm1987_vm10 = vmor %vm3105_vm6, %vm881_vm0  ;;  %v1356_v45 = vsel %vm1971_vm15, 1, %v1808_v3 }
  0xb2   :  { %v1896_v19 = vpop.trf.xlu1  ;;  %v1899_v20 = vpop.trf.xlu0  ;;  %vm1995_vm12 = vmand %vm1309_vm2, %vm1942_vm1  ;;  %vm1179_vm2 = vcmp.eq.f32.partialorder %v1882_v14, %v1880_v13  ;;  %v913_v33 = vsel %vm1987_vm10, 1, %v1808_v3 }
  0xb3   :  { %vm2016_vm14 = vmand %vm866_vm4, %vm1942_vm1  ;;  %vm1163_vm1 = vcmp.gt.f32.partialorder %v1882_v14, %v1880_v13  ;;  %vm3148_vm15 = vcmp.eq.f32.partialorder %v1899_v20, %v1880_v13 }
  0xb4   :  { %vm2032_vm0 = vmor %vm1162_vm8, %vm1178_vm9  ;;  %vm2057_vm9 = vcmp.lt.s32.totalorder %v779_v37, 0  ;;  %vm2104_vm8 = vcmp.lt.s32.totalorder %v781_v46, 0 }
  0xb5   :  { %vm2051_vm4 = vmor %vm1293_vm11, %vm1995_vm12  ;;  %vm2080_vm12 = vcmp.lt.s32.totalorder %v780_v41, 0  ;;  %v3125_v63 = vsel %vm2104_vm8, 4294967295, %v3124_v63  ;;  %v1225_v41 = vsel %vm1967_vm7, 1, %v1808_v3  ;;  %v1226_v34 = vsel %vm2032_vm0, 1, %v1808_v3 }
  0xb6   :  { %v1924_v27 = vpop.trf.xlu1  ;;  %v1937_v29 = vpop.trf.xlu0  ;;  %v3115_v52 = vsel %vm2051_vm4, 4294967295, %v3114_v52  ;;  %vm2074_vm6 = vmor %vm850_vm13, %vm2016_vm14  ;;  %vm3132_vm13 = vcmp.gt.f32.partialorder %v1863_v4, %v1884_v15  ;;  %vm2168_vm4 = vcmp.lt.s32.totalorder %v782_v60, 0  ;;  %v3136_v4 = vmov 0 }
  0xb7   :  { %v3119_v57 = vsel %vm2074_vm6, 4294967295, %v3118_v57  ;;  %vm2098_vm14 = vmor %vm1163_vm1, %vm1179_vm2  ;;  %vm3126_vm1 = vcmp.eq.f32.partialorder %v1896_v19, %v1880_v13  ;;  %v1043_v24 = vsel %vm3132_vm13, 1, %v1808_v3  ;;  %v3137_v4 = vsel %vm2168_vm4, 4294967295, %v3136_v4 }
  0xb8   :  { %v3123_v62 = vsel %vm2098_vm14, 4294967295, %v3122_v62  ;;  %vm2119_vm2 = vmand %vm3126_vm1, %vm1977_vm3  ;;  %vm3129_vm1 = vcmp.eq.f32.partialorder %v1899_v20, %v1884_v15  ;;  %vm3133_vm14 = vcmp.eq.f32.partialorder %v1924_v27, %v1880_v13  ;;  %vm3138_vm13 = vnez %v3096_v32 }
  0xb9   :  { %vm2136_vm8 = vmand %vm3129_vm1, %vm1977_vm3  ;;  %v912_v36 = vsel %vm3138_vm13, 1, %v1808_v3  ;;  %vm3139_vm3 = vcmp.gt.f32.partialorder %v1896_v19, %v1880_v13  ;;  %vm852_vm11 = vcmp.gt.f32.partialorder %v1937_v29, %v1884_v15  ;;  %vm3142_vm13 = vcmp.eq.f32.partialorder %v1937_v29, %v1884_v15 }
  0xba   :  { %v1983_v38 = vpop.trf.xlu1  ;;  %v2001_v42 = vpop.trf.xlu0  ;;  %vm2164_vm6 = vmand %vm3133_vm14, %vm2057_vm9  ;;  %vm1295_vm14 = vcmp.gt.f32.partialorder %v1924_v27, %v1880_v13  ;;  %vm3149_vm7 = vcmp.gt.f32.partialorder %v1899_v20, %v1880_v13  ;;  %vm1181_vm10 = vcmp.eq.f32.partialorder %v1937_v29, %v1880_v13  ;;  %v1059_v49 = vadd.s32 %v1043_v24, %v912_v36 }
  0xbb   :  { %vm2182_vm1 = vmor %vm3139_vm3, %vm2119_vm2  ;;  %vm869_vm2 = vcmp.eq.f32.partialorder %v2001_v42, %v1884_v15  ;;  %vm1312_vm5 = vcmp.eq.f32.partialorder %v1983_v38, %v1880_v13  ;;  %vm3152_vm0 = vcmp.gt.f32.partialorder %v1871_v8, %v1884_v15  ;;  %v790_v24 = vsub.s32 %v2147_v23, %v1869_v7 }
  0xbc   :  { %vm2195_vm4 = vmand %vm3142_vm13, %vm2057_vm9  ;;  %vm3145_vm9 = vcmp.gt.f32.partialorder %v1899_v20, %v1884_v15  ;;  %vm1165_vm13 = vcmp.gt.f32.partialorder %v1937_v29, %v1880_v13  ;;  %v1044_v53 = vsel %vm3152_vm0, 1, %v1808_v3  ;;  %v1371_v25 = vadd.s32 %v1355_v40, %v1225_v41 }
  0xbd   :  { %vm2215_vm3 = vmor %vm3145_vm9, %vm2136_vm8  ;;  %v1060_v36 = vadd.s32 %v1044_v53, %v913_v33  ;;  %v1372_v32 = vadd.s32 %v1356_v45, %v1226_v34  ;;  %vm3168_vm0 = vcmp.gt.f32.partialorder %v2001_v42, %v1884_v15  ;;  %v3172_v41 = vmov 0 }
  0xbe   :  { %v2061_v54 = vpop.trf.xlu1  ;;  %v2084_v59 = vpop.trf.xlu0  ;;  %vm2233_vm8 = vmor %vm3149_vm7, %vm3148_vm15  ;;  %vm3163_vm7 = vnez %v3115_v52  ;;  %v3178_v33 = vmov 0  ;;  %v3221_v29 = vmov 0 }
  0xbf   :  { %vm2252_vm9 = vmor %vm1295_vm14, %vm2164_vm6  ;;  %vm2276_vm14 = vcmp.lt.s32.totalorder %v783_v61, 0  ;;  %v915_v61 = vsel %vm2215_vm3, 1, %v1808_v3  ;;  %v1076_v2 = vadd.s32 %v1060_v36, %v1059_v49  ;;  %vm3188_vm3 = vcmp.gt.f32.partialorder %v2084_v59, %v1884_v15 }
  0xc0   :  { %vm2261_vm15 = vmor %vm852_vm11, %vm2195_vm4  ;;  %vm981_vm4 = vcmp.gt.f32.partialorder %v1878_v12, %v1884_v15  ;;  %v1357_v12 = vsel %vm3163_vm7, 1, %v1808_v3  ;;  %vm3167_vm7 = vnez %v3123_v62 }
  0xc1   :  { %vm2272_vm6 = vmand %vm869_vm2, %vm2080_vm12  ;;  %v1227_v52 = vsel %vm3167_vm7, 1, %v1808_v3  ;;  %v1045_v62 = vsel %vm981_vm4, 1, %v1808_v3  ;;  %vm3175_vm4 = vcmp.eq.f32.partialorder %v2084_v59, %v1884_v15  ;;  %v916_v53 = vsel %vm2261_vm15, 1, %v1808_v3 }
  0xc2   :  { %v2140_v16 = vpop.trf.xlu1  ;;  %v2172_v30 = vpop.trf.xlu0  ;;  %vm2293_vm2 = vmand %vm1312_vm5, %vm2080_vm12  ;;  %vm3166_vm5 = vnez %v3119_v57  ;;  %v1373_v8 = vadd.s32 %v1357_v12, %v1227_v52  ;;  %v1228_v52 = vsel %vm2233_vm8, 1, %v1808_v3 }
  0xc3   :  { %vm2308_vm11 = vmor %vm1165_vm13, %vm1181_vm10  ;;  %v914_v40 = vsel %vm3166_vm5, 1, %v1808_v3  ;;  %vm3174_vm10 = vnez %v3125_v63  ;;  %vm3180_vm5 = vcmp.eq.f32.partialorder %v2061_v54, %v1880_v13  ;;  %v3185_v63 = vmov 0 }
  0xc4   :  { %vm2325_vm13 = vmor %vm3168_vm0, %vm2272_vm6  ;;  %vm3171_vm6 = vcmp.gt.f32.partialorder %v1983_v38, %v1880_v13  ;;  %vm3208_vm8 = vcmp.gt.f32.partialorder %v2172_v30, %v1884_v15  ;;  %vm3214_vm15 = vcmp.gt.f32.partialorder %v2140_v16, %v1880_v13 }
  0xc5   :  { %vm2343_vm0 = vmor %vm3171_vm6, %vm2293_vm2  ;;  %vm2363_vm2 = vcmp.lt.s32.totalorder %v784_v0, 0  ;;  %v1061_v0 = vadd.s32 %v1045_v62, %v914_v40  ;;  %v1388_v40 = vadd.s32 %v1372_v32, %v1371_v25  ;;  %v1358_v25 = vsel %vm2182_vm1, 1, %v1808_v3  ;;  %v1537_v62 = vld [vmem:[#allocation7 + $0x8] sm:$0xff] }
  0xc6   :  { %v2241_v39 = vpop.trf.xlu1  ;;  %v2280_v14 = vpop.trf.xlu0  ;;  %v3173_v41 = vsel %vm2343_vm0, 4294967295, %v3172_v41  ;;  %vm2354_vm12 = vmand %vm3175_vm4, %vm3174_vm10  ;;  %v3179_v33 = vsel %vm2363_vm2, 4294967295, %v3178_v33  ;;  %vm3183_vm4 = vcmp.eq.f32.partialorder %v2001_v42, %v1880_v13  ;;  %vm3187_vm0 = vcmp.gt.f32.partialorder %v1896_v19, %v1884_v15  ;;  %1602 = vmatprep.mubr.f32.mxu0 %v1537_v62 }
  0xc7   :  { %vm2378_vm7 = vmand %vm3180_vm5, %vm3174_vm10  ;;  %vm3184_vm10 = vcmp.gt.f32.partialorder %v2001_v42, %v1880_v13  ;;  %v1046_v46 = vsel %vm3187_vm0, 1, %v1808_v3  ;;  %v3189_v42 = vmov 0  ;;  %vm3192_vm2 = vcmp.eq.f32.partialorder %v2172_v30, %v1884_v15 }
  0xc8   :  { %vm2395_vm5 = vmor %vm3184_vm10, %vm3183_vm4  ;;  %vm3191_vm10 = vnez %v3137_v4  ;;  %vm3199_vm1 = vcmp.eq.f32.partialorder %v2084_v59, %v1880_v13  ;;  %vm3200_vm4 = vcmp.gt.f32.partialorder %v2084_v59, %v1880_v13  ;;  %v1062_v12 = vadd.s32 %v1046_v46, %v915_v61 }
  0xc9   :  { %v3186_v63 = vsel %vm2395_vm5, 4294967295, %v3185_v63  ;;  %vm2410_vm6 = vmor %vm3188_vm3, %vm2354_vm12  ;;  %vm3195_vm12 = vcmp.gt.f32.partialorder %v1924_v27, %v1884_v15  ;;  %vm1315_vm0 = vcmp.eq.f32.partialorder %v2241_v39, %v1880_v13  ;;  %v1077_v35 = vadd.s32 %v1076_v2, %v1061_v0 }
  0xca   :  { %v2333_v57 = vpop.trf.xlu1  ;;  %v2367_v34 = vpop.trf.xlu0  ;;  %v3190_v42 = vsel %vm2410_vm6, 4294967295, %v3189_v42  ;;  %vm2421_vm5 = vmand %vm3192_vm2, %vm3191_vm10  ;;  %v1047_v36 = vsel %vm3195_vm12, 1, %v1808_v3  ;;  %vm3196_vm2 = vcmp.gt.f32.partialorder %v2061_v54, %v1880_v13  ;;  %vm872_vm12 = vcmp.eq.f32.partialorder %v2280_v14, %v1884_v15 }
  0xcb   :  { %vm2441_vm3 = vmor %vm3196_vm2, %vm2378_vm7  ;;  %vm2460_vm7 = vcmp.lt.s32.totalorder %v785_v1, 0  ;;  %vm3205_vm2 = vcmp.eq.f32.partialorder %v2140_v16, %v1880_v13  ;;  %v1389_v45 = vadd.s32 %v1388_v40, %v1373_v8  ;;  %v1359_v2 = vsel %vm2252_vm9, 1, %v1808_v3 }
  0xcc   :  { %vm2451_vm6 = vmor %vm3200_vm4, %vm3199_vm1  ;;  %v1229_v0 = vsel %vm2308_vm11, 1, %v1808_v3  ;;  %v1374_v20 = vadd.s32 %v1358_v25, %v1228_v52  ;;  %vm3213_vm9 = vcmp.gt.f32.partialorder %v1983_v38, %v1884_v15  ;;  %v1078_v61 = vadd.s32 %v1077_v35, %v1062_v12 }
  0xcd   :  { %vm2474_vm1 = vmand %vm3205_vm2, %vm3191_vm10  ;;  %vm1168_vm10 = vcmp.gt.f32.partialorder %v2172_v30, %v1880_v13  ;;  %vm1184_vm2 = vcmp.eq.f32.partialorder %v2172_v30, %v1880_v13  ;;  %v1048_v60 = vsel %vm3213_vm9, 1, %v1808_v3  ;;  %v917_v40 = vsel %vm2325_vm13, 1, %v1808_v3 }
  0xce   :  { %v2425_v49 = vpop.trf.xlu1  ;;  %v2480_v1 = vpop.trf.xlu0  ;;  %vm2487_vm4 = vmor %vm3208_vm8, %vm2421_vm5  ;;  %vm2561_vm13 = vcmp.lt.s32.totalorder %v786_v9, 0  ;;  %v1063_v19 = vadd.s32 %v1047_v36, %v916_v53  ;;  %v1375_v25 = vadd.s32 %v1359_v2, %v1229_v0  ;;  %v3224_v30 = vmov 0 }
  0xcf   :  { %vm2511_vm8 = vmand %vm872_vm12, %vm2276_vm14  ;;  %vm1299_vm12 = vcmp.gt.f32.partialorder %v2241_v39, %v1880_v13  ;;  %v3222_v29 = vsel %vm2561_vm13, 4294967295, %v3221_v29  ;;  %vm3227_vm9 = vnez %v3186_v63  ;;  %v3228_v12 = vmov 0 }
  0xd0   :  { %vm2524_vm11 = vmor %vm3214_vm15, %vm2474_vm1  ;;  %vm3226_vm1 = vnez %v3173_v41  ;;  %v1230_v36 = vsel %vm3227_vm9, 1, %v1808_v3  ;;  %vm3230_vm15 = vnez %v3179_v33  ;;  %v1390_v52 = vadd.s32 %v1389_v45, %v1374_v20 }
  0xd1   :  { %vm2535_vm5 = vmand %vm1315_vm0, %vm2276_vm14  ;;  %v1360_v9 = vsel %vm3226_vm1, 1, %v1808_v3  ;;  %vm3231_vm1 = vcmp.eq.f32.partialorder %v2333_v57, %v1880_v13  ;;  %v1064_v59 = vadd.s32 %v1048_v60, %v917_v40  ;;  %v1079_v33 = vadd.s32 %v1078_v61, %v1063_v19 }
  0xd2   :  { %vm2552_vm14 = vmor %vm1168_vm10, %vm1184_vm2  ;;  %v2565_v46 = vpop.trf.xlu1  ;;  %vm3223_vm10 = vcmp.gt.f32.partialorder %v2280_v14, %v1884_v15  ;;  %v2608_v63 = vpop.trf.xlu0  ;;  %v1376_v35 = vadd.s32 %v1360_v9, %v1230_v36  ;;  %v1391_v53 = vadd.s32 %v1390_v52, %v1375_v25  ;;  %v1361_v0 = vsel %vm2441_vm3, 1, %v1808_v3 }
  0xd3   :  { %vm2572_vm2 = vmor %vm3223_vm10, %vm2511_vm8  ;;  %vm1317_vm10 = vcmp.eq.f32.partialorder %v2425_v49, %v1880_v13  ;;  %v1231_v8 = vsel %vm2451_vm6, 1, %v1808_v3  ;;  %v1080_v32 = vadd.s32 %v1079_v33, %v1064_v59  ;;  %vm3251_vm3 = vcmp.gt.f32.partialorder %v2140_v16, %v1884_v15 }
  0xd4   :  { %v3225_v30 = vsel %vm2572_vm2, 4294967295, %v3224_v30  ;;  %vm2591_vm8 = vmor %vm1299_vm12, %vm2535_vm5  ;;  %vm3234_vm5 = vcmp.gt.f32.partialorder %v2061_v54, %v1884_v15  ;;  %vm3235_vm12 = vcmp.eq.f32.partialorder %v2367_v34, %v1884_v15  ;;  %vm3236_vm2 = vcmp.eq.f32.partialorder %v2280_v14, %v1880_v13 }
  0xd5   :  { %v3229_v12 = vsel %vm2591_vm8, 4294967295, %v3228_v12  ;;  %vm2602_vm0 = vmand %vm3231_vm1, %vm3230_vm15  ;;  %v1049_v62 = vsel %vm3234_vm5, 1, %v1808_v3  ;;  %vm3237_vm5 = vcmp.gt.f32.partialorder %v2280_v14, %v1880_v13  ;;  %vm3240_vm8 = vnez %v3190_v42 }
  0xd6   :  { %vm889_vm1 = vmand %vm3235_vm12, %vm3230_vm15  ;;  %v918_v45 = vsel %vm3240_vm8, 1, %v1808_v3  ;;  %vm3244_vm15 = vcmp.gt.f32.partialorder %v2367_v34, %v1884_v15  ;;  %vm874_vm12 = vcmp.eq.f32.partialorder %v2480_v1, %v1884_v15  ;;  %vm2663_vm8 = vcmp.lt.s32.totalorder %v787_v11, 0  ;;  %v2684_v20 = vpop.trf.xlu1 }
  0xd7   :  { %vm2631_vm13 = vmor %vm3237_vm5, %vm3236_vm2  ;;  %vm3241_vm2 = vcmp.gt.f32.partialorder %v2333_v57, %v1880_v13  ;;  %v1050_v27 = vsel %vm3251_vm3, 1, %v1808_v3  ;;  %vm3252_vm6 = vcmp.gt.f32.partialorder %v2241_v39, %v1884_v15  ;;  %v1065_v16 = vadd.s32 %v1049_v62, %v918_v45  ;;  %v2718_v39 = vpop.trf.xlu0 }
  0xd8   :  { %vm2647_vm5 = vmor %vm3241_vm2, %vm2602_vm0  ;;  %v1051_v60 = vsel %vm3252_vm6, 1, %v1808_v3  ;;  %vm858_vm0 = vcmp.gt.f32.partialorder %v2480_v1, %v1884_v15  ;;  %v919_v61 = vsel %vm2487_vm4, 1, %v1808_v3  ;;  %v1377_v40 = vadd.s32 %v1361_v0, %v1231_v8 }
  0xd9   :  { %vm2654_vm9 = vmor %vm3244_vm15, %vm889_vm1  ;;  %vm3253_vm15 = vcmp.eq.f32.partialorder %v2367_v34, %v1880_v13  ;;  %vm3257_vm4 = vcmp.gt.f32.partialorder %v2425_v49, %v1880_v13  ;;  %v1362_v37 = vsel %vm2524_vm11, 1, %v1808_v3  ;;  %v1232_v19 = vsel %vm2552_vm14, 1, %v1808_v3 }
  0xda   :  { %vm2680_vm1 = vmand %vm1317_vm10, %vm2460_vm7  ;;  %vm3254_vm10 = vcmp.gt.f32.partialorder %v2367_v34, %v1880_v13  ;;  %v1392_v34 = vadd.s32 %v1391_v53, %v1376_v35  ;;  %vm2750_vm3 = vcmp.lt.s32.totalorder %v788_v21, 0  ;;  %v1066_v9 = vadd.s32 %v1050_v27, %v919_v61  ;;  %v139_v41 = vpop.trf.xlu1 }
  0xdb   :  { %vm2700_vm2 = vmor %vm3254_vm10, %vm3253_vm15  ;;  %vm1318_vm15 = vcmp.eq.f32.partialorder %v2565_v46, %v1880_v13  ;;  %v3263_v58 = vsel %vm2750_vm3, 4294967295, %v3262_v58  ;;  %vm3264_vm11 = vcmp.gt.f32.partialorder %v2333_v57, %v1884_v15  ;;  %v1081_v21 = vadd.s32 %v1080_v32, %v1065_v16  ;;  %v84_v54 = vpop.trf.xlu0 }
  0xdc   :  { %vm890_vm6 = vmand %vm874_vm12, %vm2460_vm7  ;;  %vm1187_vm7 = vcmp.eq.f32.partialorder %v2480_v1, %v1880_v13  ;;  %v1052_v5 = vsel %vm3264_vm11, 1, %v1808_v3  ;;  %vm3267_vm11 = vcmp.gt.f32.partialorder %v2480_v1, %v1880_v13  ;;  %v1378_v52 = vadd.s32 %v1362_v37, %v1232_v19 }
  0xdd   :  { %vm2725_vm10 = vmor %vm3257_vm4, %vm2680_vm1  ;;  %vm3266_vm1 = vnez %v3225_v30  ;;  %vm3270_vm4 = vnez %v3229_v12  ;;  %v1233_v1 = vsel %vm2631_vm13, 1, %v1808_v3  ;;  %v1393_v12 = vadd.s32 %v1392_v34, %v1377_v40 }
  0xde   :  { %vm2739_vm12 = vmor %vm858_vm0, %vm890_vm6  ;;  %vm3265_vm0 = vnez %v3222_v29  ;;  %v920_v36 = vsel %vm3266_vm1, 1, %v1808_v3  ;;  %v1363_v30 = vsel %vm3270_vm4, 1, %v1808_v3  ;;  %vm1319_vm4 = vcmp.eq.f32.partialorder %v2684_v20, %v1880_v13 }
  0xdf   :  { %vm1334_vm6 = vmand %vm1318_vm15, %vm3265_vm0  ;;  %vm3275_vm13 = vcmp.gt.f32.partialorder %v2425_v49, %v1884_v15  ;;  %v1082_v33 = vadd.s32 %v1081_v21, %v1066_v9  ;;  %v1067_v35 = vadd.s32 %v1051_v60, %v920_v36  ;;  %v921_v49 = vsel %vm2654_vm9, 1, %v1808_v3  ;;  %v85_v40 = vpop.trf.xlu0 }
  0xe0   :  { %vm2773_vm3 = vmor %vm3267_vm11, %vm1187_vm7  ;;  %vm3271_vm7 = vcmp.gt.f32.partialorder %v2565_v46, %v1880_v13  ;;  %vm3274_vm11 = vcmp.eq.f32.partialorder %v2608_v63, %v1884_v15  ;;  %v1053_v62 = vsel %vm3275_vm13, 1, %v1808_v3  ;;  %vm3280_vm13 = vcmp.gt.f32.partialorder %v2608_v63, %v1880_v13 }
  0xe1   :  { %vm2790_vm1 = vmor %vm3271_vm7, %vm1334_vm6  ;;  %vm990_vm6 = vcmp.gt.f32.partialorder %v2565_v46, %v1884_v15  ;;  %vm3276_vm7 = vcmp.gt.f32.partialorder %v2608_v63, %v1884_v15  ;;  %v3283_v53 = vmov 0  ;;  %v1379_v2 = vadd.s32 %v1363_v30, %v1233_v1  ;;  %v140_v46 = vpop.trf.xlu1 }
  0xe2   :  { %vm891_vm14 = vmand %vm3274_vm11, %vm3265_vm0  ;;  %vm3279_vm11 = vcmp.eq.f32.partialorder %v2608_v63, %v1880_v13  ;;  %vm2834_vm0 = vcmp.lt.s32.totalorder %v789_v22, 0  ;;  %v1364_v0 = vsel %vm2647_vm5, 1, %v1808_v3  ;;  %v1234_v63 = vsel %vm2700_vm2, 1, %v1808_v3 }
  0xe3   :  { %vm2810_vm15 = vmor %vm3276_vm7, %vm891_vm14  ;;  %vm876_vm7 = vcmp.eq.f32.partialorder %v2718_v39, %v1884_v15  ;;  %v3284_v53 = vsel %vm2834_vm0, 4294967295, %v3283_v53  ;;  %v1394_v22 = vadd.s32 %v1393_v12, %v1378_v52  ;;  %v1054_v14 = vsel %vm990_vm6, 1, %v1808_v3 }
  0xe4   :  { %vm2825_vm14 = vmor %vm3280_vm13, %vm3279_vm11  ;;  %vm860_vm11 = vcmp.gt.f32.partialorder %v2718_v39, %v1884_v15  ;;  %vm3285_vm5 = vcmp.gt.f32.partialorder %v2684_v20, %v1880_v13  ;;  %v1068_v11 = vadd.s32 %v1052_v5, %v921_v49  ;;  %v922_v32 = vsel %vm2739_vm12, 1, %v1808_v3 }
  0xe5   :  { %vm1335_vm9 = vmand %vm1319_vm4, %vm2663_vm8  ;;  %vm991_vm6 = vcmp.gt.f32.partialorder %v2684_v20, %v1884_v15  ;;  %v1084_v27 = vadd.s32 %v1082_v33, %v1067_v35  ;;  %v1380_v60 = vadd.s32 %v1364_v0, %v1234_v63  ;;  %vm992_vm12 = vcmp.gt.f32.partialorder %v139_v41, %v1884_v15  ;;  %v141_v30 = vpop.trf.xlu1 }
  0xe6   :  { %vm2858_vm13 = vmor %vm3285_vm5, %vm1335_vm9  ;;  %vm1320_vm5 = vcmp.eq.f32.partialorder %v139_v41, %v1880_v13  ;;  %vm1304_vm4 = vcmp.gt.f32.partialorder %v139_v41, %v1880_v13  ;;  %v1396_v16 = vadd.s32 %v1394_v22, %v1379_v2  ;;  %v1365_v42 = vsel %vm2725_vm10, 1, %v1808_v3 }
  0xe7   :  { %vm892_vm9 = vmand %vm876_vm7, %vm2663_vm8  ;;  %v1235_v61 = vsel %vm2773_vm3, 1, %v1808_v3  ;;  %vm3290_vm8 = vcmp.eq.f32.partialorder %v2718_v39, %v1880_v13  ;;  %vm3291_vm7 = vcmp.gt.f32.partialorder %v2718_v39, %v1880_v13  ;;  %vm2903_vm10 = vcmp.lt.s32.totalorder %v790_v24, 0 }
  0xe8   :  { %vm2877_vm2 = vmor %vm860_vm11, %vm892_vm9  ;;  %v3294_v4 = vmov 0  ;;  %v1069_v37 = vadd.s32 %v1053_v62, %v922_v32  ;;  %v1055_v39 = vsel %vm991_vm6, 1, %v1808_v3  ;;  %vm3296_vm3 = vnez %v3263_v58  ;;  %v86_v62 = vpop.trf.xlu0 }
  0xe9   :  { %vm2895_vm11 = vmor %vm3291_vm7, %vm3290_vm8  ;;  %v3295_v4 = vsel %vm2903_vm10, 4294967295, %v3294_v4  ;;  %vm861_vm7 = vcmp.gt.f32.partialorder %v84_v54, %v1884_v15  ;;  %vm993_vm9 = vcmp.gt.f32.partialorder %v140_v46, %v1884_v15  ;;  %v1085_v7 = vadd.s32 %v1084_v27, %v1068_v11 }
  0xea   :  { %vm1336_vm8 = vmand %vm1320_vm5, %vm3296_vm3  ;;  %v1056_v24 = vsel %vm992_vm12, 1, %v1808_v3  ;;  %vm1174_vm6 = vcmp.gt.f32.partialorder %v84_v54, %v1880_v13  ;;  %vm1190_vm0 = vcmp.eq.f32.partialorder %v84_v54, %v1880_v13  ;;  %v1397_v20 = vadd.s32 %v1396_v16, %v1380_v60 }
  0xeb   :  { %vm2920_vm10 = vmor %vm1304_vm4, %vm1336_vm8  ;;  %v1381_v25 = vadd.s32 %v1365_v42, %v1235_v61  ;;  %v923_v9 = vsel %vm2810_vm15, 1, %v1808_v3  ;;  %vm3299_vm5 = vcmp.eq.f32.partialorder %v84_v54, %v1884_v15  ;;  %vm1321_vm4 = vcmp.eq.f32.partialorder %v140_v46, %v1880_v13 }
  0xec   :  { %vm893_vm12 = vmand %vm3299_vm5, %vm3296_vm3  ;;  %v1366_v5 = vsel %vm2790_vm1, 1, %v1808_v3  ;;  %v1236_v21 = vsel %vm2825_vm14, 1, %v1808_v3  ;;  %v1057_v57 = vsel %vm993_vm9, 1, %v1808_v3  ;;  %vm1305_vm15 = vcmp.gt.f32.partialorder %v140_v46, %v1880_v13 }
  0xed   :  { %vm2940_vm8 = vmor %vm861_vm7, %vm893_vm12  ;;  %v1088_v58 = vadd.s32 %v1085_v7, %v1069_v37  ;;  %v924_v41 = vsel %vm2877_vm2, 1, %v1808_v3  ;;  %vm862_vm1 = vcmp.gt.f32.partialorder %v85_v40, %v1884_v15  ;;  %vm878_vm14 = vcmp.eq.f32.partialorder %v85_v40, %v1884_v15 }
  0xee   :  { %vm2949_vm3 = vmor %vm1174_vm6, %vm1190_vm0  ;;  %v1070_v1 = vadd.s32 %v1054_v14, %v923_v9  ;;  %v1367_v59 = vsel %vm2858_vm13, 1, %v1808_v3  ;;  %v1237_v12 = vsel %vm2895_vm11, 1, %v1808_v3  ;;  %vm3304_vm2 = vnez %v3284_v53 }
  0xef   :  { %vm1337_vm0 = vmand %vm1321_vm4, %vm3304_vm2  ;;  %vm1175_vm9 = vcmp.gt.f32.partialorder %v85_v40, %v1880_v13  ;;  %v1400_v29 = vadd.s32 %v1397_v20, %v1381_v25  ;;  %v1382_v54 = vadd.s32 %v1366_v5, %v1236_v21  ;;  %v925_v33 = vsel %vm2940_vm8, 1, %v1808_v3 }
  0xf0   :  { %vm1353_vm13 = vmor %vm1305_vm15, %vm1337_vm0  ;;  %vm1191_vm7 = vcmp.eq.f32.partialorder %v85_v40, %v1880_v13  ;;  %v1071_v35 = vadd.s32 %v1055_v39, %v924_v41  ;;  %v1368_v49 = vsel %vm2920_vm10, 1, %v1808_v3  ;;  %v1238_v45 = vsel %vm2949_vm3, 1, %v1808_v3 }
  0xf1   :  { %vm894_vm11 = vmand %vm878_vm14, %vm3304_vm2  ;;  %vm1322_vm6 = vcmp.eq.f32.partialorder %v141_v30, %v1880_v13  ;;  %v1383_v2 = vadd.s32 %v1367_v59, %v1237_v12  ;;  %vm994_vm12 = vcmp.gt.f32.partialorder %v141_v30, %v1884_v15  ;;  %vm1306_vm4 = vcmp.gt.f32.partialorder %v141_v30, %v1880_v13  ;;  %v1387_v30 = vld [vmem:[#allocation2 + $0x1] sm:$0x1] }
  0xf2   :  { %vm910_vm5 = vmor %vm862_vm1, %vm894_vm11  ;;  %vm879_vm10 = vcmp.eq.f32.partialorder %v86_v62, %v1884_v15  ;;  %v1086_v0 = vadd.s32 %v1088_v58, %v1070_v1  ;;  %v1072_v63 = vadd.s32 %v1056_v24, %v925_v33  ;;  %v1369_v22 = vsel %vm1353_vm13, 1, %v1808_v3  ;;  %v1075_v58 = vld [vmem:[#allocation2] sm:$0x1] }
  0xf3   :  { %v926_v53 = vsel %vm910_vm5, 1, %v1808_v3  ;;  %vm1223_vm8 = vmor %vm1175_vm9, %vm1191_vm7  ;;  %v1398_v14 = vadd.s32 %v1400_v29, %v1382_v54  ;;  %v1384_v8 = vadd.s32 %v1368_v49, %v1238_v45  ;;  %vm3305_vm15 = vnez %v3295_v4 }
  0xf4   :  { %v1239_v11 = vsel %vm1223_vm8, 1, %v1808_v3  ;;  %vm1338_vm3 = vmand %vm1322_vm6, %vm3305_vm15  ;;  %vm863_vm1 = vcmp.gt.f32.partialorder %v86_v62, %v1884_v15  ;;  %v1083_v32 = vadd.s32 %v1086_v0, %v1071_v35  ;;  %v1073_v46 = vadd.s32 %v1057_v57, %v926_v53 }
  0xf5   :  { %vm1354_vm14 = vmor %vm1306_vm4, %vm1338_vm3  ;;  %vm1176_vm2 = vcmp.gt.f32.partialorder %v86_v62, %v1880_v13  ;;  %vm1192_vm0 = vcmp.eq.f32.partialorder %v86_v62, %v1880_v13  ;;  %v1395_v27 = vadd.s32 %v1398_v14, %v1383_v2  ;;  %v1385_v60 = vadd.s32 %v1369_v22, %v1239_v11 }
  0xf6   :  { %vm895_vm9 = vmand %vm879_vm10, %vm3305_vm15  ;;  %v1087_v38 = vadd.s32 %v1083_v32, %v1072_v63  ;;  %v1370_v16 = vsel %vm1354_vm14, 1, %v1808_v3  ;;  %v1058_v61 = vsel %vm994_vm12, 1, %v1808_v3  ;;  %v3306_v1 = vlaneseq }
  0xf7   :  { %vm911_vm13 = vmor %vm863_vm1, %vm895_vm9  ;;  %v1399_v42 = vadd.s32 %v1395_v27, %v1384_v8  ;;  %v1434_v62 = vsub.s32 0, %v1866_v6  ;;  %v1438_v29 = vsub.s32 1, %v1866_v6  ;;  %v1809_v49 = vmov 1.0|1.0  }
  0xf8   :  { %v927_v34 = vsel %vm911_vm13, 1, %v1808_v3  ;;  %vm1224_vm7 = vmor %vm1176_vm2, %vm1192_vm0  ;;  %v1089_v13 = vadd.s32 %v1087_v38, %v1073_v46  ;;  %vm1100_vm11 = vcmp.lt.s32.totalorder %v3306_v1, 128 }
  0xf9   :  { %v1074_v40 = vadd.s32 %v1058_v61, %v927_v34  ;;  %v1240_v37 = vsel %vm1224_vm7, 1, %v1808_v3  ;;  %v1401_v4 = vadd.s32 %v1399_v42, %v1385_v60 }
  0xfa   :  { %v1386_v39 = vadd.s32 %v1370_v16, %v1240_v37 }
  0xfb   :  { %v1090_v7 = vadd.s32 %v1089_v13, %v1074_v40 }
  0xfc   :  { %v1402_v24 = vadd.s32 %v1401_v4, %v1386_v39 }
  0xfd   :  { %v1091_v19 = vrot.slane %v1090_v7, 4 }
  0xfe   :  { %v1403_v20 = vrot.slane %v1402_v24, 4 }
  0xff   :  { %v1092_v25 = vadd.s32 %v1091_v19, %v1090_v7 }
 0x100   :  { %v1404_v9 = vadd.s32 %v1403_v20, %v1402_v24 }
 0x101   :  { %v1093_v5 = vrot.slane %v1092_v25, 2 }
 0x102   :  { %v1405_v21 = vrot.slane %v1404_v9, 2 }
 0x103   :  { %v1094_v36 = vadd.s32 %v1093_v5, %v1092_v25 }
 0x104   :  { %v1406_v15 = vadd.s32 %v1405_v21, %v1404_v9 }
 0x105   :  { %v1095_v57 = vrot.slane %v1094_v36, 1 }
 0x106   :  { %v1407_v41 = vrot.slane %v1406_v15, 1 }
 0x107   :  { %v1096_v52 = vadd.s32 %v1095_v57, %v1094_v36 }
 0x108   :  { %v1408_v3 = vadd.s32 %v1407_v41, %v1406_v15 }
 0x109   :  { %v1097_v59 = vadd.s32 %v1096_v52, %v1075_v58 }
 0x10a   :  { %v1409_v12 = vadd.s32 %v1408_v3, %v1387_v30 }
 0x10b   :  { %1102 = vst.msk [vmem:[#allocation2] sm:$0x1] %vm1100_vm11, %v1097_v59 }
 0x10c   :  { %1410 = vst.msk [vmem:[#allocation2 + $0x1] sm:$0x1] %vm1100_vm11, %v1409_v12 }
 0x113   :  { %v1414_v54 = vld [vmem:[#allocation2] sm:$0x3] }
 0x114   :  { %v3013_v33 = vrot.slane %v1414_v54, %v1434_v62  ;;  %v1439_v35 = vrot.slane %v1414_v54, %v1438_v29 }
 0x116   :  { %vm1441_vm6 = vcmp.eq.s32.totalorder %v1866_v6, %v1439_v35  ;;  %vm1443_vm5 = vcmp.eq.s32.totalorder %v1874_v10, %v1439_v35  ;;  %vm1440_vm12 = vcmp.eq.s32.totalorder %v1866_v6, %v3013_v33  ;;  %vm1442_vm4 = vcmp.eq.s32.totalorder %v1874_v10, %v3013_v33  ;;  %v1536_v6 = vld [vmem:[#allocation7] sm:$0xff] }
 0x117   :  { %vm1697_vm10 = vmpackc.low %vm1443_vm5, %vm1441_vm6  ;;  %vm1445_vm8 = vcmp.eq.s32.totalorder %v1889_v17, %v1439_v35  ;;  %vm1447_vm15 = vcmp.eq.s32.totalorder %v1894_v18, %v1439_v35  ;;  %vm1444_vm14 = vcmp.eq.s32.totalorder %v1889_v17, %v3013_v33  ;;  %vm1446_vm2 = vcmp.eq.s32.totalorder %v1894_v18, %v3013_v33 }
 0x118   :  { %1698 = vmatprep.subr.msk.bf16.mxu0 %vm1697_vm10, %v1809_v49  ;;  %vm1699_vm3 = vmpackc.low %vm1442_vm4, %vm1440_vm12  ;;  %vm1449_vm0 = vcmp.eq.s32.totalorder %v1922_v26, %v1439_v35  ;;  %vm1451_vm9 = vcmp.eq.s32.totalorder %v1927_v28, %v1439_v35  ;;  %vm1448_vm11 = vcmp.eq.s32.totalorder %v1922_v26, %v3013_v33  ;;  %vm1450_vm6 = vcmp.eq.s32.totalorder %v1927_v28, %v3013_v33 }
 0x119   :  { %1700 = vmatpush1.bf16.xpose.msk.msra.mxu0 %vm1699_vm3, %v1809_v49  ;;  %vm1701_vm1 = vmpackc.low %vm1447_vm15, %vm1445_vm8  ;;  %vm1453_vm5 = vcmp.eq.s32.totalorder %v1949_v31, %v1439_v35  ;;  %vm1455_vm12 = vcmp.eq.s32.totalorder %v2004_v43, %v1439_v35  ;;  %vm1452_vm8 = vcmp.eq.s32.totalorder %v1949_v31, %v3013_v33  ;;  %vm1454_vm15 = vcmp.eq.s32.totalorder %v2004_v43, %v3013_v33 }
 0x11a   :  { %1702 = vmatprep.subr.msk.bf16.mxu0 %vm1701_vm1, %v1809_v49  ;;  %vm1703_vm13 = vmpackc.low %vm1446_vm2, %vm1444_vm14  ;;  %vm1457_vm3 = vcmp.eq.s32.totalorder %v2007_v44, %v1439_v35  ;;  %vm1459_vm1 = vcmp.eq.s32.totalorder %v2023_v47, %v1439_v35 }
 0x11b   :  { %vm1705_vm7 = vmpackc.low %vm1451_vm9, %vm1449_vm0  ;;  %vm1456_vm0 = vcmp.eq.s32.totalorder %v2007_v44, %v3013_v33  ;;  %vm1458_vm9 = vcmp.eq.s32.totalorder %v2023_v47, %v3013_v33 }
 0x11c   :  { %vm1707_vm4 = vmpackc.low %vm1450_vm6, %vm1448_vm11 }
 0x11d   :  { %vm1709_vm10 = vmpackc.low %vm1455_vm12, %vm1453_vm5  ;;  %vm1460_vm5 = vcmp.eq.s32.totalorder %v2026_v48, %v3013_v33  ;;  %vm1462_vm12 = vcmp.eq.s32.totalorder %v2041_v50, %v3013_v33 }
 0x11e   :  { %vm1711_vm14 = vmpackc.low %vm1454_vm15, %vm1452_vm8 }
 0x11f   :  { %vm1713_vm2 = vmpackc.low %vm1459_vm1, %vm1457_vm3  ;;  %vm1464_vm3 = vcmp.eq.s32.totalorder %v2044_v51, %v3013_v33  ;;  %vm1466_vm1 = vcmp.eq.s32.totalorder %v2064_v55, %v3013_v33 }
 0x120   :  { %vm1715_vm11 = vmpackc.low %vm1458_vm9, %vm1456_vm0 }
 0x121   :  { %1704 = vmatpush1.bf16.xpose.msk.msra.mxu0 %vm1703_vm13, %v1809_v49  ;;  %vm1461_vm13 = vcmp.eq.s32.totalorder %v2026_v48, %v1439_v35  ;;  %vm1719_vm8 = vmpackc.low %vm1462_vm12, %vm1460_vm5 }
 0x122   :  { %1706 = vmatprep.subr.msk.bf16.mxu0 %vm1705_vm7, %v1809_v49  ;;  %vm1463_vm7 = vcmp.eq.s32.totalorder %v2041_v50, %v1439_v35  ;;  %vm1723_vm0 = vmpackc.low %vm1466_vm1, %vm1464_vm3 }
 0x123   :  { %vm1717_vm6 = vmpackc.low %vm1463_vm7, %vm1461_vm13  ;;  %vm1468_vm13 = vcmp.eq.s32.totalorder %v2067_v56, %v3013_v33  ;;  %vm1470_vm7 = vcmp.eq.s32.totalorder %v2147_v23, %v3013_v33 }
 0x129   :  { %1708 = vmatpush1.bf16.xpose.msk.msra.mxu0 %vm1707_vm4, %v1809_v49  ;;  %vm1465_vm4 = vcmp.eq.s32.totalorder %v2044_v51, %v1439_v35 }
 0x12a   :  { %1710 = vmatprep.subr.msk.bf16.mxu0 %vm1709_vm10, %v1809_v49  ;;  %vm1467_vm10 = vcmp.eq.s32.totalorder %v2064_v55, %v1439_v35 }
 0x12b   :  { %vm1721_vm15 = vmpackc.low %vm1467_vm10, %vm1465_vm4 }
 0x131   :  { %1712 = vmatpush1.bf16.xpose.msk.msra.mxu0 %vm1711_vm14, %v1809_v49  ;;  %vm1469_vm14 = vcmp.eq.s32.totalorder %v2067_v56, %v1439_v35 }
 0x132   :  { %1714 = vmatprep.subr.msk.bf16.mxu0 %vm1713_vm2, %v1809_v49  ;;  %vm1471_vm2 = vcmp.eq.s32.totalorder %v2147_v23, %v1439_v35 }
 0x133   :  { %vm1725_vm9 = vmpackc.low %vm1471_vm2, %vm1469_vm14 }
 0x139   :  { %1716 = vmatpush1.bf16.xpose.msk.msra.mxu0 %vm1715_vm11, %v1809_v49  ;;  %vm1727_vm11 = vmpackc.low %vm1470_vm7, %vm1468_vm13 }
 0x13a   :  { %1718 = vmatprep.subr.msk.bf16.mxu0 %vm1717_vm6, %v1809_v49 }
 0x141   :  { %1720 = vmatpush1.bf16.xpose.msk.msra.mxu0 %vm1719_vm8, %v1809_v49 }
 0x142   :  { %1722 = vmatprep.subr.msk.bf16.mxu0 %vm1721_vm15, %v1809_v49 }
 0x149   :  { %1724 = vmatpush1.bf16.xpose.msk.msra.mxu0 %vm1723_vm0, %v1809_v49 }
 0x14a   :  { %1726 = vmatprep.subr.msk.bf16.mxu0 %vm1725_vm9, %v1809_v49 }
 0x151   :  { %1728 = vmatpush1.bf16.xpose.msk.msra.mxu0 %vm1727_vm11, %v1809_v49 }
 0x158   :  { %1603 = vmatmul.mubr.f32.vlgmr.msra.gmra.mrb[0].mxu0 %v1536_v6 }
 0x22b   :  { %v1604_v10 = vpop.f32.mrb[0].mxu0 }
 0x22c   :  { %1608 = vst [vmem:[#allocation9] sm:$0xff] %v1604_v10  ;;  %v1606_v17 = vpop.f32.mrb[1].mxu0 }
 0x22d   :  { %1789 = shalt.err (!%p1786_p6)
}
 0x22e   :  { %s1790_s15 = scalar_lea.hbm %s3078_s3, 128 }
 0x22f   :  { %p1791_p7 = scmp.ne.s32.totalorder %s3078_s3, %s1790_s15  ;;  %p1794_p8 = scmp.lt.u32.totalorder %s1790_s15, %s3078_s3 }
 0x231   :  { %p1796_p9 = pnand %p1794_p8, %p1791_p7 }
 0x233   :  { %1799 = shalt.err (!%p1796_p9)
}
 0x234   :  { %1618 = dma.vmem_to_hbm [thread:$0]  %s1616_s2, 128, %s3078_s3, [#allocation6]  }
 0x235   :  { %1804 = dma.done.wait [#allocation6], 128  }
 0x236   :  { %1805 = vsyncadd [#allocation6], 4294967168 }
 0x237   :  { %1622 = vsyncpa [#allocation5], 1 }
 0x238   :  { %1623 = vsyncpa [#allocation8], 1 }
 0x239   :  { %1624 = vsyncpa [#allocation6], 1 }

</bundles_post_ra>
